<compile_context>
chip_gen: v5e
topology: v5e:2x2
jax: 0.10.0
libtpu: 0.0.40
codegen_flags: <defaults>
</compile_context>

<pallas_src>
import jax
import jax.numpy as jnp
from jax.experimental import pallas as pl
from jax.experimental.pallas import tpu as pltpu

# ---- small, deterministic problem sizes implied by the module ----
B, S, H = 2, 8, 32            # batch, seq, hidden_size
NUM_HEADS = 4
HEAD_SIZE = H // NUM_HEADS    # 8
NUM_LAYERS = 2
VOCAB = 128                   # multiple of 128 -> lane-dense logits output
FFN = 4 * H                   # 128
MAX_SEQ_LEN = 16              # rope cache length (> S, rope_cache[:S] is used)
BS = B * S                    # 16
LN_EPS = 1e-5
NH, HD, L, V = NUM_HEADS, HEAD_SIZE, NUM_LAYERS, VOCAB
NEG_INF = -1e9


# ---------------------------------------------------------------------------
# Host-side helpers (RoPE tables / signed pair-swap matrix)
# ---------------------------------------------------------------------------
def _rope_tables():
    """Per-head-tiled, pair-duplicated cos/sin for positions 0..S-1: [S, H]."""
    j = jnp.arange(HEAD_SIZE // 2, dtype=jnp.float32)
    inv_freq = 1.0 / (10000.0 ** (2.0 * j / HEAD_SIZE))
    pos = jnp.arange(S, dtype=jnp.float32)
    ang = pos[:, None] * inv_freq[None, :]                   # [S, hd/2]
    cos_sh = jnp.tile(jnp.repeat(jnp.cos(ang), 2, axis=-1), (1, NUM_HEADS))
    sin_sh = jnp.tile(jnp.repeat(jnp.sin(ang), 2, axis=-1), (1, NUM_HEADS))
    return cos_sh, sin_sh                                    # [S, H] each


def _pswap():
    """Signed pair-swap: (x @ P)[2j] = -x[2j+1], (x @ P)[2j+1] = x[2j]."""
    Pm = jnp.zeros((H, H), jnp.float32)
    idx = jnp.arange(0, H, 2)
    Pm = Pm.at[idx + 1, idx].set(-1.0)
    Pm = Pm.at[idx, idx + 1].set(1.0)
    return Pm


# ---------------------------------------------------------------------------
# Fused whole-model kernel (single invocation; everything resident in VMEM)
# ---------------------------------------------------------------------------
def toy_transformer_kernel(ids_ref, cos_ref, sin_ref, embed_ref,
                           wqkv_ref, bqkv_ref, wo_ref, bo_ref,
                           ln1g_ref, ln1b_ref, ln2g_ref, ln2b_ref,
                           wu_ref, bu_ref, wd_ref, bd_ref,
                           wlm_ref, blm_ref,
                           logits_ref, kv_ref):
    f32 = jnp.float32
    cos2d = cos_ref[...]                                   # [BS, H]
    sin2d = sin_ref[...]                                   # [BS, H]

    # ---- embedding lookup as a one-hot matmul (gather-free) ----
    ids = ids_ref[...]                                     # [BS, 1] int32
    onehot = (jax.lax.broadcasted_iota(jnp.int32, (BS, V), 1) == ids).astype(f32)
    h = jnp.dot(onehot, embed_ref[...], preferred_element_type=f32)  # [BS, H]

    # ---- causal additive bias generated in-kernel (no input DMA) ----
    rows = jax.lax.broadcasted_iota(jnp.int32, (S, S), 0)
    cols = jax.lax.broadcasted_iota(jnp.int32, (S, S), 1)
    mask = jnp.where(rows >= cols, 0.0, NEG_INF).astype(f32)          # [S, S]

    def layernorm(t, g, b):
        mu = jnp.mean(t, axis=-1, keepdims=True)
        var = jnp.mean((t - mu) ** 2, axis=-1, keepdims=True)
        return (t - mu) * jax.lax.rsqrt(var + LN_EPS) * g + b

    def gelu_tanh(t):
        c = 0.7978845608028654  # sqrt(2/pi)
        return 0.5 * t * (1.0 + jnp.tanh(c * (t + 0.044715 * t * t * t)))

    def split_heads(t2):
        # [BS, H] -> [B*NH, S, HD] using only lane slices + leading-axis concat
        t3 = t2.reshape(B, S, H)
        return jnp.concatenate(
            [t3[:, :, i * HD:(i + 1) * HD] for i in range(NH)], axis=0)

    kv_slabs = []
    for l in range(L):                       # static unroll over layers (L=2)
        # ---------------- attention ----------------
        x_ln = layernorm(h, ln1g_ref[l], ln1b_ref[l])                 # [BS, H]
        # one fused projection: [q*s | k | v | (q@P)*s | k@P]
        qkvr = (jnp.dot(x_ln, wqkv_ref[l], preferred_element_type=f32)
                + bqkv_ref[l])                                        # [BS, 5H]
        q2 = qkvr[:, 0 * H:1 * H] * cos2d + qkvr[:, 3 * H:4 * H] * sin2d
        k2 = qkvr[:, 1 * H:2 * H] * cos2d + qkvr[:, 4 * H:5 * H] * sin2d
        v2 = qkvr[:, 2 * H:3 * H]

        qh, kh, vh = split_heads(q2), split_heads(k2), split_heads(v2)
        scores = jnp.einsum('bqd,bkd->bqk', qh, kh,
                            preferred_element_type=f32) + mask[None]  # [B*NH,S,S]
        m = jnp.max(scores, axis=-1, keepdims=True)
        p = jnp.exp(scores - m)
        p = p * pl.reciprocal(jnp.sum(p, axis=-1, keepdims=True), approx=True)
        ctx = jnp.einsum('bqk,bkd->bqd', p, vh,
                         preferred_element_type=f32)                  # [B*NH,S,HD]
        attn2 = jnp.concatenate(
            [ctx[i * B:(i + 1) * B].reshape(BS, HD) for i in range(NH)],
            axis=1)                                                   # [BS, H]

        h = h + jnp.dot(attn2, wo_ref[l], preferred_element_type=f32) + bo_ref[l]

        # ---------------- feed-forward ----------------
        h_ln = layernorm(h, ln2g_ref[l], ln2b_ref[l])
        up = jnp.dot(h_ln, wu_ref[l], preferred_element_type=f32) + bu_ref[l]
        h = (h + jnp.dot(gelu_tanh(up), wd_ref[l],
                         preferred_element_type=f32) + bd_ref[l])

        kv_slabs.append(k2)   # post-RoPE k cache (heads stacked along H)
        kv_slabs.append(v2)   # v cache

    # ---------------- lm head + lane-dense stores ----------------
    logits_ref[...] = (jnp.dot(h, wlm_ref[...], preferred_element_type=f32)
                       + blm_ref[...])                                # [BS, 128]
    kv_ref[...] = jnp.concatenate(kv_slabs, axis=1)                   # [BS, 128]


# ---------------------------------------------------------------------------
# Wrapper: host-side weight fusion + single pallas_call
# ---------------------------------------------------------------------------
@jax.jit
def toy_transformer_forward(ids, params):
    P = _pswap()
    scale = 1.0 / (HEAD_SIZE ** 0.5)

    w_qkv, b_qkv = [], []
    for l in range(L):
        wq, wk, wv = params['wq'][l], params['wk'][l], params['wv'][l]
        bq, bk, bv = params['bq'][l], params['bk'][l], params['bv'][l]
        w_qkv.append(jnp.concatenate(
            [wq * scale, wk, wv, (wq @ P) * scale, wk @ P], axis=1))  # [H, 5H]
        b_qkv.append(jnp.concatenate(
            [bq * scale, bk, bv, (bq @ P) * scale, bk @ P], axis=1))  # [1, 5H]
    w_qkv = jnp.stack(w_qkv)                                          # [L, H, 5H]
    b_qkv = jnp.stack(b_qkv)                                          # [L, 1, 5H]

    cos_sh, sin_sh = _rope_tables()                                   # [S, H]
    cos2d = jnp.tile(cos_sh, (B, 1))                                  # [BS, H]
    sin2d = jnp.tile(sin_sh, (B, 1))
    ids2 = ids.reshape(BS, 1).astype(jnp.int32)

    args = (ids2, cos2d, sin2d, params['embed'],
            w_qkv, b_qkv, params['wo'], params['bo'],
            params['ln1_g'], params['ln1_b'], params['ln2_g'], params['ln2_b'],
            params['wu'], params['bu'], params['wd'], params['bd'],
            params['w_lm'], params['b_lm'])

    vmem = lambda: pl.BlockSpec(memory_space=pltpu.MemorySpace.VMEM)
    out_shapes = (jax.ShapeDtypeStruct((BS, V), jnp.float32),          # logits
                  jax.ShapeDtypeStruct((BS, 2 * L * H), jnp.float32))  # kv slab

    logits_flat, kv_flat = pl.pallas_call(
        toy_transformer_kernel,
        out_shape=out_shapes,
        in_specs=[vmem() for _ in args],
        out_specs=(vmem(), vmem()),
    )(*args)

    logits = logits_flat.reshape(B, S, V)
    kv5 = kv_flat.reshape(B, S, L, 2, H)        # lane order = (layer, k/v, H)
    k_cache = jnp.transpose(kv5[:, :, :, 0, :], (2, 0, 1, 3))  # [L, B, S, H]
    v_cache = jnp.transpose(kv5[:, :, :, 1, :], (2, 0, 1, 3))
    return logits, k_cache, v_cache


# ---------------------------------------------------------------------------
# Deterministic parameters + pure-JAX reference of the torch module
# ---------------------------------------------------------------------------
def make_params(key):
    def uni(k, shape, fan_in):
        bnd = 1.0 / (fan_in ** 0.5)
        return jax.random.uniform(k, shape, jnp.float32, -bnd, bnd)

    keys = jax.random.split(key, 3 + 12 * L)
    ki = iter(range(len(keys)))
    nk = lambda: keys[next(ki)]

    p = {'embed': jax.random.normal(nk(), (V, H), jnp.float32),
         'w_lm': uni(nk(), (H, V), H),
         'b_lm': uni(nk(), (1, V), H)}

    def per_layer(shape, fan_in):
        return jnp.stack([uni(nk(), shape, fan_in) for _ in range(L)])

    p['wq'] = per_layer((H, H), H);     p['bq'] = per_layer((1, H), H)
    p['wk'] = per_layer((H, H), H);     p['bk'] = per_layer((1, H), H)
    p['wv'] = per_layer((H, H), H);     p['bv'] = per_layer((1, H), H)
    p['wo'] = per_layer((H, H), H);     p['bo'] = per_layer((1, H), H)
    p['wu'] = per_layer((H, FFN), H);   p['bu'] = per_layer((1, FFN), H)
    p['wd'] = per_layer((FFN, H), FFN); p['bd'] = per_layer((1, H), FFN)
    p['ln1_g'] = jnp.ones((L, 1, H), jnp.float32)
    p['ln1_b'] = jnp.zeros((L, 1, H), jnp.float32)
    p['ln2_g'] = jnp.ones((L, 1, H), jnp.float32)
    p['ln2_b'] = jnp.zeros((L, 1, H), jnp.float32)
    return p


def reference_forward(ids, p):
    """Pure-JAX reference of ToyTransformer.forward (kv_cache=None, causal)."""
    cos_sh, sin_sh = _rope_tables()
    P = _pswap()
    tri = jnp.tril(jnp.ones((S, S), jnp.bool_))
    bias = jnp.where(tri, 0.0, NEG_INF).astype(jnp.float32)

    def ln(t, g, b):
        mu = jnp.mean(t, -1, keepdims=True)
        var = jnp.mean((t - mu) ** 2, -1, keepdims=True)
        return (t - mu) / jnp.sqrt(var + LN_EPS) * g + b

    rope = lambda t: t * cos_sh[None] + (t @ P) * sin_sh[None]

    h = p['embed'][ids]                                       # [B, S, H]
    ks, vs = [], []
    for l in range(L):
        x_ln = ln(h, p['ln1_g'][l], p['ln1_b'][l])
        q = rope(x_ln @ p['wq'][l] + p['bq'][l])
        k = rope(x_ln @ p['wk'][l] + p['bk'][l])
        v = x_ln @ p['wv'][l] + p['bv'][l]
        outs = []
        for hh in range(NH):
            sl = slice(hh * HD, (hh + 1) * HD)
            s = (jnp.einsum('bqd,bkd->bqk', q[..., sl], k[..., sl])
                 / (HD ** 0.5) + bias[None])
            outs.append(jnp.einsum('bqk,bkd->bqd',
                                   jax.nn.softmax(s, -1), v[..., sl]))
        attn = jnp.concatenate(outs, -1)
        h = h + attn @ p['wo'][l] + p['bo'][l]
        h_ln = ln(h, p['ln2_g'][l], p['ln2_b'][l])
        ffn = (jax.nn.gelu(h_ln @ p['wu'][l] + p['bu'][l], approximate=False)
               @ p['wd'][l] + p['bd'][l])
        h = h + ffn
        ks.append(k); vs.append(v)
    logits = h @ p['w_lm'] + p['b_lm']
    return logits, jnp.stack(ks), jnp.stack(vs)


if __name__ == "__main__":
    key = jax.random.PRNGKey(0)
    k_ids, k_p = jax.random.split(key)
    params = make_params(k_p)
    ids = jax.random.randint(k_ids, (B, S), 0, V, dtype=jnp.int32)

    logits, k_cache, v_cache = toy_transformer_forward(ids, params)
    jax.block_until_ready((logits, k_cache, v_cache))

    ref_logits, ref_k, ref_v = reference_forward(ids, params)
    assert logits.shape == (B, S, V)
    assert k_cache.shape == (L, B, S, H) and v_cache.shape == (L, B, S, H)
    assert float(jnp.max(jnp.abs(logits - ref_logits))) < 1e-2
    assert float(jnp.max(jnp.abs(k_cache - ref_k))) < 1e-2
    assert float(jnp.max(jnp.abs(v_cache - ref_v))) < 1e-2

    print("KERNEL_OK")
</pallas_src>

<mosaic_0001>
module attributes {stable_mosaic.version = 11 : i64} {
  func.func @toy_transformer_kernel(%arg0: memref<16x1xi32, #tpu.memory_space<vmem>>, %arg1: memref<16x32xf32, #tpu.memory_space<vmem>>, %arg2: memref<16x32xf32, #tpu.memory_space<vmem>>, %arg3: memref<128x32xf32, #tpu.memory_space<vmem>>, %arg4: memref<2x32x160xf32, #tpu.memory_space<vmem>>, %arg5: memref<2x1x160xf32, #tpu.memory_space<vmem>>, %arg6: memref<2x32x32xf32, #tpu.memory_space<vmem>>, %arg7: memref<2x1x32xf32, #tpu.memory_space<vmem>>, %arg8: memref<2x1x32xf32, #tpu.memory_space<vmem>>, %arg9: memref<2x1x32xf32, #tpu.memory_space<vmem>>, %arg10: memref<2x1x32xf32, #tpu.memory_space<vmem>>, %arg11: memref<2x1x32xf32, #tpu.memory_space<vmem>>, %arg12: memref<2x32x128xf32, #tpu.memory_space<vmem>>, %arg13: memref<2x1x128xf32, #tpu.memory_space<vmem>>, %arg14: memref<2x128x32xf32, #tpu.memory_space<vmem>>, %arg15: memref<2x1x32xf32, #tpu.memory_space<vmem>>, %arg16: memref<32x128xf32, #tpu.memory_space<vmem>>, %arg17: memref<1x128xf32, #tpu.memory_space<vmem>>, %arg18: memref<16x128xf32, #tpu.memory_space<vmem>>, %arg19: memref<16x128xf32, #tpu.memory_space<vmem>>) attributes {dimension_semantics = [], scalar_prefetch = 0 : i64, scratch_operands = 0 : i64, tpu.core_type = #tpu.core_type<tc>} {
    %c0 = arith.constant 0 : index
    %c0_0 = arith.constant 0 : index
    %0 = vector.load %arg1[%c0, %c0_0] : memref<16x32xf32, #tpu.memory_space<vmem>>, vector<16x32xf32>
    %c0_1 = arith.constant 0 : index
    %c0_2 = arith.constant 0 : index
    %1 = vector.load %arg2[%c0_1, %c0_2] : memref<16x32xf32, #tpu.memory_space<vmem>>, vector<16x32xf32>
    %c0_3 = arith.constant 0 : index
    %c0_4 = arith.constant 0 : index
    %2 = vector.load %arg0[%c0_3, %c0_4] : memref<16x1xi32, #tpu.memory_space<vmem>>, vector<16x1xi32>
    %3 = tpu.iota {dimensions = array<i32: 1>} : vector<16x128xi32>
    %4 = vector.broadcast %2 : vector<16x1xi32> to vector<16x128xi32>
    %5 = arith.cmpi eq, %3, %4 : vector<16x128xi32>
    %6 = arith.extui %5 : vector<16x128xi1> to vector<16x128xi32>
    %7 = arith.sitofp %6 : vector<16x128xi32> to vector<16x128xf32>
    %c0_5 = arith.constant 0 : index
    %c0_6 = arith.constant 0 : index
    %8 = vector.load %arg3[%c0_5, %c0_6] : memref<128x32xf32, #tpu.memory_space<vmem>>, vector<128x32xf32>
    %cst = arith.constant dense<0.000000e+00> : vector<16x32xf32>
    %9 = tpu.matmul %7, %8, %cst {dimension_numbers = #tpu.dot_dimension_numbers<[1], [0], [0], [1], [0, 0, 1, 1], [], []>} : vector<16x128xf32>, vector<128x32xf32>, vector<16x32xf32> -> vector<16x32xf32>
    %10 = tpu.iota {dimensions = array<i32: 0>} : vector<8x8xi32>
    %11 = tpu.iota {dimensions = array<i32: 1>} : vector<8x8xi32>
    %12 = arith.cmpi sge, %10, %11 : vector<8x8xi32>
    %cst_7 = arith.constant 0.000000e+00 : f32
    %cst_8 = arith.constant -1.000000e+09 : f32
    %13 = vector.broadcast %cst_7 : f32 to vector<8x8xf32>
    %14 = vector.broadcast %cst_8 : f32 to vector<8x8xf32>
    %15 = arith.select %12, %13, %14 : vector<8x8xi1>, vector<8x8xf32>
    %c0_9 = arith.constant 0 : index
    %c0_10 = arith.constant 0 : index
    %c0_11 = arith.constant 0 : index
    %16 = vector.load %arg8[%c0_9, %c0_10, %c0_11] : memref<2x1x32xf32, #tpu.memory_space<vmem>>, vector<1x1x32xf32>
    %17 = vector.shape_cast %16 : vector<1x1x32xf32> to vector<1x32xf32>
    %c0_12 = arith.constant 0 : index
    %c0_13 = arith.constant 0 : index
    %c0_14 = arith.constant 0 : index
    %18 = vector.load %arg9[%c0_12, %c0_13, %c0_14] : memref<2x1x32xf32, #tpu.memory_space<vmem>>, vector<1x1x32xf32>
    %19 = vector.shape_cast %18 : vector<1x1x32xf32> to vector<1x32xf32>
    %cst_15 = arith.constant dense<0.000000e+00> : vector<16xf32>
    %20 = vector.multi_reduction <add>, %9, %cst_15 [1] : vector<16x32xf32> to vector<16xf32>
    %21 = vector.shape_cast %20 : vector<16xf32> to vector<16x1xf32>
    %cst_16 = arith.constant 3.200000e+01 : f32
    %22 = vector.broadcast %cst_16 : f32 to vector<16x1xf32>
    %23 = arith.divf %21, %22 : vector<16x1xf32>
    %24 = vector.broadcast %23 : vector<16x1xf32> to vector<16x32xf32>
    %25 = arith.subf %9, %24 : vector<16x32xf32>
    %26 = arith.mulf %25, %25 : vector<16x32xf32>
    %cst_17 = arith.constant dense<0.000000e+00> : vector<16xf32>
    %27 = vector.multi_reduction <add>, %26, %cst_17 [1] : vector<16x32xf32> to vector<16xf32>
    %28 = vector.shape_cast %27 : vector<16xf32> to vector<16x1xf32>
    %cst_18 = arith.constant 3.200000e+01 : f32
    %29 = vector.broadcast %cst_18 : f32 to vector<16x1xf32>
    %30 = arith.divf %28, %29 : vector<16x1xf32>
    %31 = vector.broadcast %23 : vector<16x1xf32> to vector<16x32xf32>
    %32 = arith.subf %9, %31 : vector<16x32xf32>
    %cst_19 = arith.constant 9.99999974E-6 : f32
    %33 = vector.broadcast %cst_19 : f32 to vector<16x1xf32>
    %34 = arith.addf %30, %33 : vector<16x1xf32>
    %35 = math.rsqrt %34 : vector<16x1xf32>
    %36 = vector.broadcast %35 : vector<16x1xf32> to vector<16x32xf32>
    %37 = arith.mulf %32, %36 : vector<16x32xf32>
    %38 = vector.broadcast %17 : vector<1x32xf32> to vector<16x32xf32>
    %39 = arith.mulf %37, %38 : vector<16x32xf32>
    %40 = vector.broadcast %19 : vector<1x32xf32> to vector<16x32xf32>
    %41 = arith.addf %39, %40 : vector<16x32xf32>
    %c0_20 = arith.constant 0 : index
    %c0_21 = arith.constant 0 : index
    %c0_22 = arith.constant 0 : index
    %42 = vector.load %arg4[%c0_20, %c0_21, %c0_22] : memref<2x32x160xf32, #tpu.memory_space<vmem>>, vector<1x32x160xf32>
    %43 = vector.shape_cast %42 : vector<1x32x160xf32> to vector<32x160xf32>
    %cst_23 = arith.constant dense<0.000000e+00> : vector<16x160xf32>
    %44 = tpu.matmul %41, %43, %cst_23 {dimension_numbers = #tpu.dot_dimension_numbers<[1], [0], [0], [1], [0, 0, 1, 1], [], []>} : vector<16x32xf32>, vector<32x160xf32>, vector<16x160xf32> -> vector<16x160xf32>
    %c0_24 = arith.constant 0 : index
    %c0_25 = arith.constant 0 : index
    %c0_26 = arith.constant 0 : index
    %45 = vector.load %arg5[%c0_24, %c0_25, %c0_26] : memref<2x1x160xf32, #tpu.memory_space<vmem>>, vector<1x1x160xf32>
    %46 = vector.shape_cast %45 : vector<1x1x160xf32> to vector<1x160xf32>
    %47 = vector.broadcast %46 : vector<1x160xf32> to vector<16x160xf32>
    %48 = arith.addf %44, %47 : vector<16x160xf32>
    %49 = vector.extract_strided_slice %48 {offsets = [0, 0], sizes = [16, 32], strides = [1, 1]} : vector<16x160xf32> to vector<16x32xf32>
    %50 = arith.mulf %49, %0 : vector<16x32xf32>
    %51 = vector.extract_strided_slice %48 {offsets = [0, 96], sizes = [16, 32], strides = [1, 1]} : vector<16x160xf32> to vector<16x32xf32>
    %52 = arith.mulf %51, %1 : vector<16x32xf32>
    %53 = arith.addf %50, %52 : vector<16x32xf32>
    %54 = vector.extract_strided_slice %48 {offsets = [0, 32], sizes = [16, 32], strides = [1, 1]} : vector<16x160xf32> to vector<16x32xf32>
    %55 = arith.mulf %54, %0 : vector<16x32xf32>
    %56 = vector.extract_strided_slice %48 {offsets = [0, 128], sizes = [16, 32], strides = [1, 1]} : vector<16x160xf32> to vector<16x32xf32>
    %57 = arith.mulf %56, %1 : vector<16x32xf32>
    %58 = arith.addf %55, %57 : vector<16x32xf32>
    %59 = vector.extract_strided_slice %48 {offsets = [0, 64], sizes = [16, 32], strides = [1, 1]} : vector<16x160xf32> to vector<16x32xf32>
    %60 = vector.shape_cast %53 : vector<16x32xf32> to vector<2x8x32xf32>
    %61 = vector.extract_strided_slice %60 {offsets = [0, 0, 0], sizes = [2, 8, 8], strides = [1, 1, 1]} : vector<2x8x32xf32> to vector<2x8x8xf32>
    %62 = vector.extract_strided_slice %60 {offsets = [0, 0, 8], sizes = [2, 8, 8], strides = [1, 1, 1]} : vector<2x8x32xf32> to vector<2x8x8xf32>
    %63 = vector.extract_strided_slice %60 {offsets = [0, 0, 16], sizes = [2, 8, 8], strides = [1, 1, 1]} : vector<2x8x32xf32> to vector<2x8x8xf32>
    %64 = vector.extract_strided_slice %60 {offsets = [0, 0, 24], sizes = [2, 8, 8], strides = [1, 1, 1]} : vector<2x8x32xf32> to vector<2x8x8xf32>
    %65 = tpu.concatenate %61, %62, %63, %64 in 0 : vector<2x8x8xf32>, vector<2x8x8xf32>, vector<2x8x8xf32>, vector<2x8x8xf32> -> vector<8x8x8xf32>
    %66 = vector.shape_cast %58 : vector<16x32xf32> to vector<2x8x32xf32>
    %67 = vector.extract_strided_slice %66 {offsets = [0, 0, 0], sizes = [2, 8, 8], strides = [1, 1, 1]} : vector<2x8x32xf32> to vector<2x8x8xf32>
    %68 = vector.extract_strided_slice %66 {offsets = [0, 0, 8], sizes = [2, 8, 8], strides = [1, 1, 1]} : vector<2x8x32xf32> to vector<2x8x8xf32>
    %69 = vector.extract_strided_slice %66 {offsets = [0, 0, 16], sizes = [2, 8, 8], strides = [1, 1, 1]} : vector<2x8x32xf32> to vector<2x8x8xf32>
    %70 = vector.extract_strided_slice %66 {offsets = [0, 0, 24], sizes = [2, 8, 8], strides = [1, 1, 1]} : vector<2x8x32xf32> to vector<2x8x8xf32>
    %71 = tpu.concatenate %67, %68, %69, %70 in 0 : vector<2x8x8xf32>, vector<2x8x8xf32>, vector<2x8x8xf32>, vector<2x8x8xf32> -> vector<8x8x8xf32>
    %72 = vector.shape_cast %59 : vector<16x32xf32> to vector<2x8x32xf32>
    %73 = vector.extract_strided_slice %72 {offsets = [0, 0, 0], sizes = [2, 8, 8], strides = [1, 1, 1]} : vector<2x8x32xf32> to vector<2x8x8xf32>
    %74 = vector.extract_strided_slice %72 {offsets = [0, 0, 8], sizes = [2, 8, 8], strides = [1, 1, 1]} : vector<2x8x32xf32> to vector<2x8x8xf32>
    %75 = vector.extract_strided_slice %72 {offsets = [0, 0, 16], sizes = [2, 8, 8], strides = [1, 1, 1]} : vector<2x8x32xf32> to vector<2x8x8xf32>
    %76 = vector.extract_strided_slice %72 {offsets = [0, 0, 24], sizes = [2, 8, 8], strides = [1, 1, 1]} : vector<2x8x32xf32> to vector<2x8x8xf32>
    %77 = tpu.concatenate %73, %74, %75, %76 in 0 : vector<2x8x8xf32>, vector<2x8x8xf32>, vector<2x8x8xf32>, vector<2x8x8xf32> -> vector<8x8x8xf32>
    "tpu.trace_start"() <{level = 10 : i32, message = "bqd,bkd->bqk"}> : () -> ()
    %cst_27 = arith.constant dense<0.000000e+00> : vector<8x8x8xf32>
    %78 = tpu.matmul %65, %71, %cst_27 {dimension_numbers = #tpu.dot_dimension_numbers<[2], [2], [1], [1], [0, 0, 0, 1, 1, 1], [0], [0]>} : vector<8x8x8xf32>, vector<8x8x8xf32>, vector<8x8x8xf32> -> vector<8x8x8xf32>
    "tpu.trace_stop"() : () -> ()
    %79 = vector.shape_cast %15 : vector<8x8xf32> to vector<1x8x8xf32>
    %80 = vector.broadcast %79 : vector<1x8x8xf32> to vector<8x8x8xf32>
    %81 = arith.addf %78, %80 : vector<8x8x8xf32>
    %cst_28 = arith.constant dense<0xFF800000> : vector<8x8xf32>
    %82 = vector.multi_reduction <maximumf>, %81, %cst_28 [2] : vector<8x8x8xf32> to vector<8x8xf32>
    %83 = vector.shape_cast %82 : vector<8x8xf32> to vector<8x8x1xf32>
    %84 = vector.broadcast %83 : vector<8x8x1xf32> to vector<8x8x8xf32>
    %85 = arith.subf %81, %84 : vector<8x8x8xf32>
    %86 = math.exp %85 : vector<8x8x8xf32>
    %cst_29 = arith.constant dense<0.000000e+00> : vector<8x8xf32>
    %87 = vector.multi_reduction <add>, %86, %cst_29 [2] : vector<8x8x8xf32> to vector<8x8xf32>
    %88 = vector.shape_cast %87 : vector<8x8xf32> to vector<8x8x1xf32>
    %89 = tpu.reciprocal %88 {approx = true} : vector<8x8x1xf32> -> vector<8x8x1xf32>
    %90 = vector.broadcast %89 : vector<8x8x1xf32> to vector<8x8x8xf32>
    %91 = arith.mulf %86, %90 : vector<8x8x8xf32>
    "tpu.trace_start"() <{level = 10 : i32, message = "bqk,bkd->bqd"}> : () -> ()
    %cst_30 = arith.constant dense<0.000000e+00> : vector<8x8x8xf32>
    %92 = tpu.matmul %91, %77, %cst_30 {dimension_numbers = #tpu.dot_dimension_numbers<[2], [1], [1], [2], [0, 0, 0, 1, 1, 2], [0], [0]>} : vector<8x8x8xf32>, vector<8x8x8xf32>, vector<8x8x8xf32> -> vector<8x8x8xf32>
    "tpu.trace_stop"() : () -> ()
    %93 = vector.extract_strided_slice %92 {offsets = [0, 0, 0], sizes = [2, 8, 8], strides = [1, 1, 1]} : vector<8x8x8xf32> to vector<2x8x8xf32>
    %94 = vector.shape_cast %93 : vector<2x8x8xf32> to vector<16x8xf32>
    %95 = vector.extract_strided_slice %92 {offsets = [2, 0, 0], sizes = [2, 8, 8], strides = [1, 1, 1]} : vector<8x8x8xf32> to vector<2x8x8xf32>
    %96 = vector.shape_cast %95 : vector<2x8x8xf32> to vector<16x8xf32>
    %97 = vector.extract_strided_slice %92 {offsets = [4, 0, 0], sizes = [2, 8, 8], strides = [1, 1, 1]} : vector<8x8x8xf32> to vector<2x8x8xf32>
    %98 = vector.shape_cast %97 : vector<2x8x8xf32> to vector<16x8xf32>
    %99 = vector.extract_strided_slice %92 {offsets = [6, 0, 0], sizes = [2, 8, 8], strides = [1, 1, 1]} : vector<8x8x8xf32> to vector<2x8x8xf32>
    %100 = vector.shape_cast %99 : vector<2x8x8xf32> to vector<16x8xf32>
    %101 = tpu.concatenate %94, %96, %98, %100 in 1 : vector<16x8xf32>, vector<16x8xf32>, vector<16x8xf32>, vector<16x8xf32> -> vector<16x32xf32>
    %c0_31 = arith.constant 0 : index
    %c0_32 = arith.constant 0 : index
    %c0_33 = arith.constant 0 : index
    %102 = vector.load %arg6[%c0_31, %c0_32, %c0_33] : memref<2x32x32xf32, #tpu.memory_space<vmem>>, vector<1x32x32xf32>
    %103 = vector.shape_cast %102 : vector<1x32x32xf32> to vector<32x32xf32>
    %cst_34 = arith.constant dense<0.000000e+00> : vector<16x32xf32>
    %104 = tpu.matmul %101, %103, %cst_34 {dimension_numbers = #tpu.dot_dimension_numbers<[1], [0], [0], [1], [0, 0, 1, 1], [], []>} : vector<16x32xf32>, vector<32x32xf32>, vector<16x32xf32> -> vector<16x32xf32>
    %105 = arith.addf %9, %104 : vector<16x32xf32>
    %c0_35 = arith.constant 0 : index
    %c0_36 = arith.constant 0 : index
    %c0_37 = arith.constant 0 : index
    %106 = vector.load %arg7[%c0_35, %c0_36, %c0_37] : memref<2x1x32xf32, #tpu.memory_space<vmem>>, vector<1x1x32xf32>
    %107 = vector.shape_cast %106 : vector<1x1x32xf32> to vector<1x32xf32>
    %108 = vector.broadcast %107 : vector<1x32xf32> to vector<16x32xf32>
    %109 = arith.addf %105, %108 : vector<16x32xf32>
    %c0_38 = arith.constant 0 : index
    %c0_39 = arith.constant 0 : index
    %c0_40 = arith.constant 0 : index
    %110 = vector.load %arg10[%c0_38, %c0_39, %c0_40] : memref<2x1x32xf32, #tpu.memory_space<vmem>>, vector<1x1x32xf32>
    %111 = vector.shape_cast %110 : vector<1x1x32xf32> to vector<1x32xf32>
    %c0_41 = arith.constant 0 : index
    %c0_42 = arith.constant 0 : index
    %c0_43 = arith.constant 0 : index
    %112 = vector.load %arg11[%c0_41, %c0_42, %c0_43] : memref<2x1x32xf32, #tpu.memory_space<vmem>>, vector<1x1x32xf32>
    %113 = vector.shape_cast %112 : vector<1x1x32xf32> to vector<1x32xf32>
    %cst_44 = arith.constant dense<0.000000e+00> : vector<16xf32>
    %114 = vector.multi_reduction <add>, %109, %cst_44 [1] : vector<16x32xf32> to vector<16xf32>
    %115 = vector.shape_cast %114 : vector<16xf32> to vector<16x1xf32>
    %cst_45 = arith.constant 3.200000e+01 : f32
    %116 = vector.broadcast %cst_45 : f32 to vector<16x1xf32>
    %117 = arith.divf %115, %116 : vector<16x1xf32>
    %118 = vector.broadcast %117 : vector<16x1xf32> to vector<16x32xf32>
    %119 = arith.subf %109, %118 : vector<16x32xf32>
    %120 = arith.mulf %119, %119 : vector<16x32xf32>
    %cst_46 = arith.constant dense<0.000000e+00> : vector<16xf32>
    %121 = vector.multi_reduction <add>, %120, %cst_46 [1] : vector<16x32xf32> to vector<16xf32>
    %122 = vector.shape_cast %121 : vector<16xf32> to vector<16x1xf32>
    %cst_47 = arith.constant 3.200000e+01 : f32
    %123 = vector.broadcast %cst_47 : f32 to vector<16x1xf32>
    %124 = arith.divf %122, %123 : vector<16x1xf32>
    %125 = vector.broadcast %117 : vector<16x1xf32> to vector<16x32xf32>
    %126 = arith.subf %109, %125 : vector<16x32xf32>
    %cst_48 = arith.constant 9.99999974E-6 : f32
    %127 = vector.broadcast %cst_48 : f32 to vector<16x1xf32>
    %128 = arith.addf %124, %127 : vector<16x1xf32>
    %129 = math.rsqrt %128 : vector<16x1xf32>
    %130 = vector.broadcast %129 : vector<16x1xf32> to vector<16x32xf32>
    %131 = arith.mulf %126, %130 : vector<16x32xf32>
    %132 = vector.broadcast %111 : vector<1x32xf32> to vector<16x32xf32>
    %133 = arith.mulf %131, %132 : vector<16x32xf32>
    %134 = vector.broadcast %113 : vector<1x32xf32> to vector<16x32xf32>
    %135 = arith.addf %133, %134 : vector<16x32xf32>
    %c0_49 = arith.constant 0 : index
    %c0_50 = arith.constant 0 : index
    %c0_51 = arith.constant 0 : index
    %136 = vector.load %arg12[%c0_49, %c0_50, %c0_51] : memref<2x32x128xf32, #tpu.memory_space<vmem>>, vector<1x32x128xf32>
    %137 = vector.shape_cast %136 : vector<1x32x128xf32> to vector<32x128xf32>
    %cst_52 = arith.constant dense<0.000000e+00> : vector<16x128xf32>
    %138 = tpu.matmul %135, %137, %cst_52 {dimension_numbers = #tpu.dot_dimension_numbers<[1], [0], [0], [1], [0, 0, 1, 1], [], []>} : vector<16x32xf32>, vector<32x128xf32>, vector<16x128xf32> -> vector<16x128xf32>
    %c0_53 = arith.constant 0 : index
    %c0_54 = arith.constant 0 : index
    %c0_55 = arith.constant 0 : index
    %139 = vector.load %arg13[%c0_53, %c0_54, %c0_55] : memref<2x1x128xf32, #tpu.memory_space<vmem>>, vector<1x1x128xf32>
    %140 = vector.shape_cast %139 : vector<1x1x128xf32> to vector<1x128xf32>
    %141 = vector.broadcast %140 : vector<1x128xf32> to vector<16x128xf32>
    %142 = arith.addf %138, %141 : vector<16x128xf32>
    %cst_56 = arith.constant 5.000000e-01 : f32
    %143 = vector.broadcast %cst_56 : f32 to vector<16x128xf32>
    %144 = arith.mulf %143, %142 : vector<16x128xf32>
    %cst_57 = arith.constant 4.471500e-02 : f32
    %145 = vector.broadcast %cst_57 : f32 to vector<16x128xf32>
    %146 = arith.mulf %145, %142 : vector<16x128xf32>
    %147 = arith.mulf %146, %142 : vector<16x128xf32>
    %148 = arith.mulf %147, %142 : vector<16x128xf32>
    %149 = arith.addf %142, %148 : vector<16x128xf32>
    %cst_58 = arith.constant 0.797884583 : f32
    %150 = vector.broadcast %cst_58 : f32 to vector<16x128xf32>
    %151 = arith.mulf %150, %149 : vector<16x128xf32>
    %152 = math.tanh %151 : vector<16x128xf32>
    %cst_59 = arith.constant 1.000000e+00 : f32
    %153 = vector.broadcast %cst_59 : f32 to vector<16x128xf32>
    %154 = arith.addf %153, %152 : vector<16x128xf32>
    %155 = arith.mulf %144, %154 : vector<16x128xf32>
    %c0_60 = arith.constant 0 : index
    %c0_61 = arith.constant 0 : index
    %c0_62 = arith.constant 0 : index
    %156 = vector.load %arg14[%c0_60, %c0_61, %c0_62] : memref<2x128x32xf32, #tpu.memory_space<vmem>>, vector<1x128x32xf32>
    %157 = vector.shape_cast %156 : vector<1x128x32xf32> to vector<128x32xf32>
    %cst_63 = arith.constant dense<0.000000e+00> : vector<16x32xf32>
    %158 = tpu.matmul %155, %157, %cst_63 {dimension_numbers = #tpu.dot_dimension_numbers<[1], [0], [0], [1], [0, 0, 1, 1], [], []>} : vector<16x128xf32>, vector<128x32xf32>, vector<16x32xf32> -> vector<16x32xf32>
    %159 = arith.addf %109, %158 : vector<16x32xf32>
    %c0_64 = arith.constant 0 : index
    %c0_65 = arith.constant 0 : index
    %c0_66 = arith.constant 0 : index
    %160 = vector.load %arg15[%c0_64, %c0_65, %c0_66] : memref<2x1x32xf32, #tpu.memory_space<vmem>>, vector<1x1x32xf32>
    %161 = vector.shape_cast %160 : vector<1x1x32xf32> to vector<1x32xf32>
    %162 = vector.broadcast %161 : vector<1x32xf32> to vector<16x32xf32>
    %163 = arith.addf %159, %162 : vector<16x32xf32>
    %c1 = arith.constant 1 : index
    %c0_67 = arith.constant 0 : index
    %c0_68 = arith.constant 0 : index
    %164 = vector.load %arg8[%c1, %c0_67, %c0_68] : memref<2x1x32xf32, #tpu.memory_space<vmem>>, vector<1x1x32xf32>
    %165 = vector.shape_cast %164 : vector<1x1x32xf32> to vector<1x32xf32>
    %c1_69 = arith.constant 1 : index
    %c0_70 = arith.constant 0 : index
    %c0_71 = arith.constant 0 : index
    %166 = vector.load %arg9[%c1_69, %c0_70, %c0_71] : memref<2x1x32xf32, #tpu.memory_space<vmem>>, vector<1x1x32xf32>
    %167 = vector.shape_cast %166 : vector<1x1x32xf32> to vector<1x32xf32>
    %cst_72 = arith.constant dense<0.000000e+00> : vector<16xf32>
    %168 = vector.multi_reduction <add>, %163, %cst_72 [1] : vector<16x32xf32> to vector<16xf32>
    %169 = vector.shape_cast %168 : vector<16xf32> to vector<16x1xf32>
    %cst_73 = arith.constant 3.200000e+01 : f32
    %170 = vector.broadcast %cst_73 : f32 to vector<16x1xf32>
    %171 = arith.divf %169, %170 : vector<16x1xf32>
    %172 = vector.broadcast %171 : vector<16x1xf32> to vector<16x32xf32>
    %173 = arith.subf %163, %172 : vector<16x32xf32>
    %174 = arith.mulf %173, %173 : vector<16x32xf32>
    %cst_74 = arith.constant dense<0.000000e+00> : vector<16xf32>
    %175 = vector.multi_reduction <add>, %174, %cst_74 [1] : vector<16x32xf32> to vector<16xf32>
    %176 = vector.shape_cast %175 : vector<16xf32> to vector<16x1xf32>
    %cst_75 = arith.constant 3.200000e+01 : f32
    %177 = vector.broadcast %cst_75 : f32 to vector<16x1xf32>
    %178 = arith.divf %176, %177 : vector<16x1xf32>
    %179 = vector.broadcast %171 : vector<16x1xf32> to vector<16x32xf32>
    %180 = arith.subf %163, %179 : vector<16x32xf32>
    %cst_76 = arith.constant 9.99999974E-6 : f32
    %181 = vector.broadcast %cst_76 : f32 to vector<16x1xf32>
    %182 = arith.addf %178, %181 : vector<16x1xf32>
    %183 = math.rsqrt %182 : vector<16x1xf32>
    %184 = vector.broadcast %183 : vector<16x1xf32> to vector<16x32xf32>
    %185 = arith.mulf %180, %184 : vector<16x32xf32>
    %186 = vector.broadcast %165 : vector<1x32xf32> to vector<16x32xf32>
    %187 = arith.mulf %185, %186 : vector<16x32xf32>
    %188 = vector.broadcast %167 : vector<1x32xf32> to vector<16x32xf32>
    %189 = arith.addf %187, %188 : vector<16x32xf32>
    %c1_77 = arith.constant 1 : index
    %c0_78 = arith.constant 0 : index
    %c0_79 = arith.constant 0 : index
    %190 = vector.load %arg4[%c1_77, %c0_78, %c0_79] : memref<2x32x160xf32, #tpu.memory_space<vmem>>, vector<1x32x160xf32>
    %191 = vector.shape_cast %190 : vector<1x32x160xf32> to vector<32x160xf32>
    %cst_80 = arith.constant dense<0.000000e+00> : vector<16x160xf32>
    %192 = tpu.matmul %189, %191, %cst_80 {dimension_numbers = #tpu.dot_dimension_numbers<[1], [0], [0], [1], [0, 0, 1, 1], [], []>} : vector<16x32xf32>, vector<32x160xf32>, vector<16x160xf32> -> vector<16x160xf32>
    %c1_81 = arith.constant 1 : index
    %c0_82 = arith.constant 0 : index
    %c0_83 = arith.constant 0 : index
    %193 = vector.load %arg5[%c1_81, %c0_82, %c0_83] : memref<2x1x160xf32, #tpu.memory_space<vmem>>, vector<1x1x160xf32>
    %194 = vector.shape_cast %193 : vector<1x1x160xf32> to vector<1x160xf32>
    %195 = vector.broadcast %194 : vector<1x160xf32> to vector<16x160xf32>
    %196 = arith.addf %192, %195 : vector<16x160xf32>
    %197 = vector.extract_strided_slice %196 {offsets = [0, 0], sizes = [16, 32], strides = [1, 1]} : vector<16x160xf32> to vector<16x32xf32>
    %198 = arith.mulf %197, %0 : vector<16x32xf32>
    %199 = vector.extract_strided_slice %196 {offsets = [0, 96], sizes = [16, 32], strides = [1, 1]} : vector<16x160xf32> to vector<16x32xf32>
    %200 = arith.mulf %199, %1 : vector<16x32xf32>
    %201 = arith.addf %198, %200 : vector<16x32xf32>
    %202 = vector.extract_strided_slice %196 {offsets = [0, 32], sizes = [16, 32], strides = [1, 1]} : vector<16x160xf32> to vector<16x32xf32>
    %203 = arith.mulf %202, %0 : vector<16x32xf32>
    %204 = vector.extract_strided_slice %196 {offsets = [0, 128], sizes = [16, 32], strides = [1, 1]} : vector<16x160xf32> to vector<16x32xf32>
    %205 = arith.mulf %204, %1 : vector<16x32xf32>
    %206 = arith.addf %203, %205 : vector<16x32xf32>
    %207 = vector.extract_strided_slice %196 {offsets = [0, 64], sizes = [16, 32], strides = [1, 1]} : vector<16x160xf32> to vector<16x32xf32>
    %208 = vector.shape_cast %201 : vector<16x32xf32> to vector<2x8x32xf32>
    %209 = vector.extract_strided_slice %208 {offsets = [0, 0, 0], sizes = [2, 8, 8], strides = [1, 1, 1]} : vector<2x8x32xf32> to vector<2x8x8xf32>
    %210 = vector.extract_strided_slice %208 {offsets = [0, 0, 8], sizes = [2, 8, 8], strides = [1, 1, 1]} : vector<2x8x32xf32> to vector<2x8x8xf32>
    %211 = vector.extract_strided_slice %208 {offsets = [0, 0, 16], sizes = [2, 8, 8], strides = [1, 1, 1]} : vector<2x8x32xf32> to vector<2x8x8xf32>
    %212 = vector.extract_strided_slice %208 {offsets = [0, 0, 24], sizes = [2, 8, 8], strides = [1, 1, 1]} : vector<2x8x32xf32> to vector<2x8x8xf32>
    %213 = tpu.concatenate %209, %210, %211, %212 in 0 : vector<2x8x8xf32>, vector<2x8x8xf32>, vector<2x8x8xf32>, vector<2x8x8xf32> -> vector<8x8x8xf32>
    %214 = vector.shape_cast %206 : vector<16x32xf32> to vector<2x8x32xf32>
    %215 = vector.extract_strided_slice %214 {offsets = [0, 0, 0], sizes = [2, 8, 8], strides = [1, 1, 1]} : vector<2x8x32xf32> to vector<2x8x8xf32>
    %216 = vector.extract_strided_slice %214 {offsets = [0, 0, 8], sizes = [2, 8, 8], strides = [1, 1, 1]} : vector<2x8x32xf32> to vector<2x8x8xf32>
    %217 = vector.extract_strided_slice %214 {offsets = [0, 0, 16], sizes = [2, 8, 8], strides = [1, 1, 1]} : vector<2x8x32xf32> to vector<2x8x8xf32>
    %218 = vector.extract_strided_slice %214 {offsets = [0, 0, 24], sizes = [2, 8, 8], strides = [1, 1, 1]} : vector<2x8x32xf32> to vector<2x8x8xf32>
    %219 = tpu.concatenate %215, %216, %217, %218 in 0 : vector<2x8x8xf32>, vector<2x8x8xf32>, vector<2x8x8xf32>, vector<2x8x8xf32> -> vector<8x8x8xf32>
    %220 = vector.shape_cast %207 : vector<16x32xf32> to vector<2x8x32xf32>
    %221 = vector.extract_strided_slice %220 {offsets = [0, 0, 0], sizes = [2, 8, 8], strides = [1, 1, 1]} : vector<2x8x32xf32> to vector<2x8x8xf32>
    %222 = vector.extract_strided_slice %220 {offsets = [0, 0, 8], sizes = [2, 8, 8], strides = [1, 1, 1]} : vector<2x8x32xf32> to vector<2x8x8xf32>
    %223 = vector.extract_strided_slice %220 {offsets = [0, 0, 16], sizes = [2, 8, 8], strides = [1, 1, 1]} : vector<2x8x32xf32> to vector<2x8x8xf32>
    %224 = vector.extract_strided_slice %220 {offsets = [0, 0, 24], sizes = [2, 8, 8], strides = [1, 1, 1]} : vector<2x8x32xf32> to vector<2x8x8xf32>
    %225 = tpu.concatenate %221, %222, %223, %224 in 0 : vector<2x8x8xf32>, vector<2x8x8xf32>, vector<2x8x8xf32>, vector<2x8x8xf32> -> vector<8x8x8xf32>
    "tpu.trace_start"() <{level = 10 : i32, message = "bqd,bkd->bqk"}> : () -> ()
    %cst_84 = arith.constant dense<0.000000e+00> : vector<8x8x8xf32>
    %226 = tpu.matmul %213, %219, %cst_84 {dimension_numbers = #tpu.dot_dimension_numbers<[2], [2], [1], [1], [0, 0, 0, 1, 1, 1], [0], [0]>} : vector<8x8x8xf32>, vector<8x8x8xf32>, vector<8x8x8xf32> -> vector<8x8x8xf32>
    "tpu.trace_stop"() : () -> ()
    %227 = vector.shape_cast %15 : vector<8x8xf32> to vector<1x8x8xf32>
    %228 = vector.broadcast %227 : vector<1x8x8xf32> to vector<8x8x8xf32>
    %229 = arith.addf %226, %228 : vector<8x8x8xf32>
    %cst_85 = arith.constant dense<0xFF800000> : vector<8x8xf32>
    %230 = vector.multi_reduction <maximumf>, %229, %cst_85 [2] : vector<8x8x8xf32> to vector<8x8xf32>
    %231 = vector.shape_cast %230 : vector<8x8xf32> to vector<8x8x1xf32>
    %232 = vector.broadcast %231 : vector<8x8x1xf32> to vector<8x8x8xf32>
    %233 = arith.subf %229, %232 : vector<8x8x8xf32>
    %234 = math.exp %233 : vector<8x8x8xf32>
    %cst_86 = arith.constant dense<0.000000e+00> : vector<8x8xf32>
    %235 = vector.multi_reduction <add>, %234, %cst_86 [2] : vector<8x8x8xf32> to vector<8x8xf32>
    %236 = vector.shape_cast %235 : vector<8x8xf32> to vector<8x8x1xf32>
    %237 = tpu.reciprocal %236 {approx = true} : vector<8x8x1xf32> -> vector<8x8x1xf32>
    %238 = vector.broadcast %237 : vector<8x8x1xf32> to vector<8x8x8xf32>
    %239 = arith.mulf %234, %238 : vector<8x8x8xf32>
    "tpu.trace_start"() <{level = 10 : i32, message = "bqk,bkd->bqd"}> : () -> ()
    %cst_87 = arith.constant dense<0.000000e+00> : vector<8x8x8xf32>
    %240 = tpu.matmul %239, %225, %cst_87 {dimension_numbers = #tpu.dot_dimension_numbers<[2], [1], [1], [2], [0, 0, 0, 1, 1, 2], [0], [0]>} : vector<8x8x8xf32>, vector<8x8x8xf32>, vector<8x8x8xf32> -> vector<8x8x8xf32>
    "tpu.trace_stop"() : () -> ()
    %241 = vector.extract_strided_slice %240 {offsets = [0, 0, 0], sizes = [2, 8, 8], strides = [1, 1, 1]} : vector<8x8x8xf32> to vector<2x8x8xf32>
    %242 = vector.shape_cast %241 : vector<2x8x8xf32> to vector<16x8xf32>
    %243 = vector.extract_strided_slice %240 {offsets = [2, 0, 0], sizes = [2, 8, 8], strides = [1, 1, 1]} : vector<8x8x8xf32> to vector<2x8x8xf32>
    %244 = vector.shape_cast %243 : vector<2x8x8xf32> to vector<16x8xf32>
    %245 = vector.extract_strided_slice %240 {offsets = [4, 0, 0], sizes = [2, 8, 8], strides = [1, 1, 1]} : vector<8x8x8xf32> to vector<2x8x8xf32>
    %246 = vector.shape_cast %245 : vector<2x8x8xf32> to vector<16x8xf32>
    %247 = vector.extract_strided_slice %240 {offsets = [6, 0, 0], sizes = [2, 8, 8], strides = [1, 1, 1]} : vector<8x8x8xf32> to vector<2x8x8xf32>
    %248 = vector.shape_cast %247 : vector<2x8x8xf32> to vector<16x8xf32>
    %249 = tpu.concatenate %242, %244, %246, %248 in 1 : vector<16x8xf32>, vector<16x8xf32>, vector<16x8xf32>, vector<16x8xf32> -> vector<16x32xf32>
    %c1_88 = arith.constant 1 : index
    %c0_89 = arith.constant 0 : index
    %c0_90 = arith.constant 0 : index
    %250 = vector.load %arg6[%c1_88, %c0_89, %c0_90] : memref<2x32x32xf32, #tpu.memory_space<vmem>>, vector<1x32x32xf32>
    %251 = vector.shape_cast %250 : vector<1x32x32xf32> to vector<32x32xf32>
    %cst_91 = arith.constant dense<0.000000e+00> : vector<16x32xf32>
    %252 = tpu.matmul %249, %251, %cst_91 {dimension_numbers = #tpu.dot_dimension_numbers<[1], [0], [0], [1], [0, 0, 1, 1], [], []>} : vector<16x32xf32>, vector<32x32xf32>, vector<16x32xf32> -> vector<16x32xf32>
    %253 = arith.addf %163, %252 : vector<16x32xf32>
    %c1_92 = arith.constant 1 : index
    %c0_93 = arith.constant 0 : index
    %c0_94 = arith.constant 0 : index
    %254 = vector.load %arg7[%c1_92, %c0_93, %c0_94] : memref<2x1x32xf32, #tpu.memory_space<vmem>>, vector<1x1x32xf32>
    %255 = vector.shape_cast %254 : vector<1x1x32xf32> to vector<1x32xf32>
    %256 = vector.broadcast %255 : vector<1x32xf32> to vector<16x32xf32>
    %257 = arith.addf %253, %256 : vector<16x32xf32>
    %c1_95 = arith.constant 1 : index
    %c0_96 = arith.constant 0 : index
    %c0_97 = arith.constant 0 : index
    %258 = vector.load %arg10[%c1_95, %c0_96, %c0_97] : memref<2x1x32xf32, #tpu.memory_space<vmem>>, vector<1x1x32xf32>
    %259 = vector.shape_cast %258 : vector<1x1x32xf32> to vector<1x32xf32>
    %c1_98 = arith.constant 1 : index
    %c0_99 = arith.constant 0 : index
    %c0_100 = arith.constant 0 : index
    %260 = vector.load %arg11[%c1_98, %c0_99, %c0_100] : memref<2x1x32xf32, #tpu.memory_space<vmem>>, vector<1x1x32xf32>
    %261 = vector.shape_cast %260 : vector<1x1x32xf32> to vector<1x32xf32>
    %cst_101 = arith.constant dense<0.000000e+00> : vector<16xf32>
    %262 = vector.multi_reduction <add>, %257, %cst_101 [1] : vector<16x32xf32> to vector<16xf32>
    %263 = vector.shape_cast %262 : vector<16xf32> to vector<16x1xf32>
    %cst_102 = arith.constant 3.200000e+01 : f32
    %264 = vector.broadcast %cst_102 : f32 to vector<16x1xf32>
    %265 = arith.divf %263, %264 : vector<16x1xf32>
    %266 = vector.broadcast %265 : vector<16x1xf32> to vector<16x32xf32>
    %267 = arith.subf %257, %266 : vector<16x32xf32>
    %268 = arith.mulf %267, %267 : vector<16x32xf32>
    %cst_103 = arith.constant dense<0.000000e+00> : vector<16xf32>
    %269 = vector.multi_reduction <add>, %268, %cst_103 [1] : vector<16x32xf32> to vector<16xf32>
    %270 = vector.shape_cast %269 : vector<16xf32> to vector<16x1xf32>
    %cst_104 = arith.constant 3.200000e+01 : f32
    %271 = vector.broadcast %cst_104 : f32 to vector<16x1xf32>
    %272 = arith.divf %270, %271 : vector<16x1xf32>
    %273 = vector.broadcast %265 : vector<16x1xf32> to vector<16x32xf32>
    %274 = arith.subf %257, %273 : vector<16x32xf32>
    %cst_105 = arith.constant 9.99999974E-6 : f32
    %275 = vector.broadcast %cst_105 : f32 to vector<16x1xf32>
    %276 = arith.addf %272, %275 : vector<16x1xf32>
    %277 = math.rsqrt %276 : vector<16x1xf32>
    %278 = vector.broadcast %277 : vector<16x1xf32> to vector<16x32xf32>
    %279 = arith.mulf %274, %278 : vector<16x32xf32>
    %280 = vector.broadcast %259 : vector<1x32xf32> to vector<16x32xf32>
    %281 = arith.mulf %279, %280 : vector<16x32xf32>
    %282 = vector.broadcast %261 : vector<1x32xf32> to vector<16x32xf32>
    %283 = arith.addf %281, %282 : vector<16x32xf32>
    %c1_106 = arith.constant 1 : index
    %c0_107 = arith.constant 0 : index
    %c0_108 = arith.constant 0 : index
    %284 = vector.load %arg12[%c1_106, %c0_107, %c0_108] : memref<2x32x128xf32, #tpu.memory_space<vmem>>, vector<1x32x128xf32>
    %285 = vector.shape_cast %284 : vector<1x32x128xf32> to vector<32x128xf32>
    %cst_109 = arith.constant dense<0.000000e+00> : vector<16x128xf32>
    %286 = tpu.matmul %283, %285, %cst_109 {dimension_numbers = #tpu.dot_dimension_numbers<[1], [0], [0], [1], [0, 0, 1, 1], [], []>} : vector<16x32xf32>, vector<32x128xf32>, vector<16x128xf32> -> vector<16x128xf32>
    %c1_110 = arith.constant 1 : index
    %c0_111 = arith.constant 0 : index
    %c0_112 = arith.constant 0 : index
    %287 = vector.load %arg13[%c1_110, %c0_111, %c0_112] : memref<2x1x128xf32, #tpu.memory_space<vmem>>, vector<1x1x128xf32>
    %288 = vector.shape_cast %287 : vector<1x1x128xf32> to vector<1x128xf32>
    %289 = vector.broadcast %288 : vector<1x128xf32> to vector<16x128xf32>
    %290 = arith.addf %286, %289 : vector<16x128xf32>
    %cst_113 = arith.constant 5.000000e-01 : f32
    %291 = vector.broadcast %cst_113 : f32 to vector<16x128xf32>
    %292 = arith.mulf %291, %290 : vector<16x128xf32>
    %cst_114 = arith.constant 4.471500e-02 : f32
    %293 = vector.broadcast %cst_114 : f32 to vector<16x128xf32>
    %294 = arith.mulf %293, %290 : vector<16x128xf32>
    %295 = arith.mulf %294, %290 : vector<16x128xf32>
    %296 = arith.mulf %295, %290 : vector<16x128xf32>
    %297 = arith.addf %290, %296 : vector<16x128xf32>
    %cst_115 = arith.constant 0.797884583 : f32
    %298 = vector.broadcast %cst_115 : f32 to vector<16x128xf32>
    %299 = arith.mulf %298, %297 : vector<16x128xf32>
    %300 = math.tanh %299 : vector<16x128xf32>
    %cst_116 = arith.constant 1.000000e+00 : f32
    %301 = vector.broadcast %cst_116 : f32 to vector<16x128xf32>
    %302 = arith.addf %301, %300 : vector<16x128xf32>
    %303 = arith.mulf %292, %302 : vector<16x128xf32>
    %c1_117 = arith.constant 1 : index
    %c0_118 = arith.constant 0 : index
    %c0_119 = arith.constant 0 : index
    %304 = vector.load %arg14[%c1_117, %c0_118, %c0_119] : memref<2x128x32xf32, #tpu.memory_space<vmem>>, vector<1x128x32xf32>
    %305 = vector.shape_cast %304 : vector<1x128x32xf32> to vector<128x32xf32>
    %cst_120 = arith.constant dense<0.000000e+00> : vector<16x32xf32>
    %306 = tpu.matmul %303, %305, %cst_120 {dimension_numbers = #tpu.dot_dimension_numbers<[1], [0], [0], [1], [0, 0, 1, 1], [], []>} : vector<16x128xf32>, vector<128x32xf32>, vector<16x32xf32> -> vector<16x32xf32>
    %307 = arith.addf %257, %306 : vector<16x32xf32>
    %c1_121 = arith.constant 1 : index
    %c0_122 = arith.constant 0 : index
    %c0_123 = arith.constant 0 : index
    %308 = vector.load %arg15[%c1_121, %c0_122, %c0_123] : memref<2x1x32xf32, #tpu.memory_space<vmem>>, vector<1x1x32xf32>
    %309 = vector.shape_cast %308 : vector<1x1x32xf32> to vector<1x32xf32>
    %310 = vector.broadcast %309 : vector<1x32xf32> to vector<16x32xf32>
    %311 = arith.addf %307, %310 : vector<16x32xf32>
    %c0_124 = arith.constant 0 : index
    %c0_125 = arith.constant 0 : index
    %312 = vector.load %arg16[%c0_124, %c0_125] : memref<32x128xf32, #tpu.memory_space<vmem>>, vector<32x128xf32>
    %cst_126 = arith.constant dense<0.000000e+00> : vector<16x128xf32>
    %313 = tpu.matmul %311, %312, %cst_126 {dimension_numbers = #tpu.dot_dimension_numbers<[1], [0], [0], [1], [0, 0, 1, 1], [], []>} : vector<16x32xf32>, vector<32x128xf32>, vector<16x128xf32> -> vector<16x128xf32>
    %c0_127 = arith.constant 0 : index
    %c0_128 = arith.constant 0 : index
    %314 = vector.load %arg17[%c0_127, %c0_128] : memref<1x128xf32, #tpu.memory_space<vmem>>, vector<1x128xf32>
    %315 = vector.broadcast %314 : vector<1x128xf32> to vector<16x128xf32>
    %316 = arith.addf %313, %315 : vector<16x128xf32>
    %c0_129 = arith.constant 0 : index
    %c0_130 = arith.constant 0 : index
    %317 = vector.load %arg18[%c0_129, %c0_130] : memref<16x128xf32, #tpu.memory_space<vmem>>, vector<16x128xf32>
    tpu.vector_store %arg18[%c0_129, %c0_130], %316 {strides = array<i32>} : memref<16x128xf32, #tpu.memory_space<vmem>>, vector<16x128xf32>,
    %318 = tpu.concatenate %58, %59, %206, %207 in 1 : vector<16x32xf32>, vector<16x32xf32>, vector<16x32xf32>, vector<16x32xf32> -> vector<16x128xf32>
    %c0_131 = arith.constant 0 : index
    %c0_132 = arith.constant 0 : index
    %319 = vector.load %arg19[%c0_131, %c0_132] : memref<16x128xf32, #tpu.memory_space<vmem>>, vector<16x128xf32>
    tpu.vector_store %arg19[%c0_131, %c0_132], %318 {strides = array<i32>} : memref<16x128xf32, #tpu.memory_space<vmem>>, vector<16x128xf32>,
    return
  }
}

</mosaic_0001>

<bundles_post_ra>
// kernel: toy_transformer_forward.1
= control target key start
LH: loop header
LB: loop body
LE: loop exit
PB: predicated region body
PF: predicated region fallthrough
CT: control target
= control target key end

     0   :  { %s3325_s0 = inlined_call_operand.vmem [shape: s32[16,1], index: 0, kind: input, shape index: {}]   ;;  %s3326_s1 = inlined_call_operand.vmem [shape: f32[16,32], index: 1, kind: input, shape index: {}]   ;;  %s3327_s2 = inlined_call_operand.vmem [shape: f32[16,32], index: 2, kind: input, shape index: {}]   ;;  %s3328_s3 = inlined_call_operand.vmem [shape: f32[128,32], index: 3, kind: input, shape index: {}]   ;;  %s3329_s4 = inlined_call_operand.vmem [shape: f32[2,32,160], index: 4, kind: input, shape index: {}]   ;;  %s3330_s5 = inlined_call_operand.vmem [shape: f32[2,1,160], index: 5, kind: input, shape index: {}]   ;;  %s3331_s6 = inlined_call_operand.vmem [shape: f32[2,32,32], index: 6, kind: input, shape index: {}]   ;;  %s3332_s7 = inlined_call_operand.vmem [shape: f32[2,1,32], index: 7, kind: input, shape index: {}]   ;;  %s3333_s8 = inlined_call_operand.vmem [shape: f32[2,1,32], index: 8, kind: input, shape index: {}]   ;;  %s3334_s9 = inlined_call_operand.vmem [shape: f32[2,1,32], index: 9, kind: input, shape index: {}]   ;;  %s3335_s10 = inlined_call_operand.vmem [shape: f32[2,1,32], index: 10, kind: input, shape index: {}]   ;;  %s3336_s11 = inlined_call_operand.vmem [shape: f32[2,1,32], index: 11, kind: input, shape index: {}]   ;;  %s3337_s12 = inlined_call_operand.vmem [shape: f32[2,32,128], index: 12, kind: input, shape index: {}]   ;;  %s3338_s13 = inlined_call_operand.vmem [shape: f32[2,1,128], index: 13, kind: input, shape index: {}]   ;;  %s3339_s14 = inlined_call_operand.vmem [shape: f32[2,128,32], index: 14, kind: input, shape index: {}]   ;;  %s3340_s15 = inlined_call_operand.vmem [shape: f32[2,1,32], index: 15, kind: input, shape index: {}]   ;;  %s3341_s16 = inlined_call_operand.vmem [shape: f32[32,128], index: 16, kind: input, shape index: {}]   ;;  %s3342_s17 = inlined_call_operand.vmem [shape: f32[1,128], index: 17, kind: input, shape index: {}]   ;;  %s3343_s18 = inlined_call_operand.hbm [shape: f32[16,128], index: 18, kind: output, shape index: {0}]   ;;  %s3344_s19 = inlined_call_operand.vmem [shape: f32[16,128], index: 19, kind: output, shape index: {1}]  }
   0x1   :  { %3362 = sst [smem:[#allocation5_spill]] %s3325_s0 }
   0x2   :  { %3363 = sst [smem:[#allocation6_spill]] %s3326_s1 }
   0x3   :  { %3364 = sst [smem:[#allocation7_spill]] %s3327_s2 }
   0x4   :  { %3365 = sst [smem:[#allocation8_spill]] %s3328_s3 }
   0x5   :  { %3366 = sst [smem:[#allocation9_spill]] %s3338_s13 }
   0x6   :  { %s3367_s20 = sld [smem:[#allocation5_spill]]  ;;  %v2430_v2 = vmov 0  }
   0x7   :  { %s3368_s13 = sld [smem:[#allocation8_spill]]  ;;  %2234 = vset.pattern.permute.xlu0 %v2430_v2 }
   0xc   :  { %v66_v0 = vld [vmem:[%s3367_s20] sm:$0xff]  ;;  %v67_v6 = vld [vmem:[%s3367_s20 + $0x8] sm:$0xff] }
   0xd   :  { %v97_v1 = vld [vmem:[%s3368_s13 + $0x78] sm:$0xff]  ;;  %v96_v3 = vld [vmem:[%s3368_s13 + $0x70] sm:$0xff]  ;;  %71 = vperm.xlu0 %2234, %v66_v0   ;;  %v95_v4 = vld [vmem:[%s3368_s13 + $0x68] sm:$0xff] }
   0xe   :  { %98 = vmatpush.msra.mxu0 %v97_v1  ;;  %v94_v5 = vld [vmem:[%s3368_s13 + $0x60] sm:$0xff]  ;;  %v93_v7 = vld [vmem:[%s3368_s13 + $0x58] sm:$0xff]  ;;  %v92_v8 = vld [vmem:[%s3368_s13 + $0x50] sm:$0xff] }
   0xf   :  { %v91_v9 = vld [vmem:[%s3368_s13 + $0x48] sm:$0xff] }
  0x10   :  { %99 = vmatpush.msra.mxu0 %v96_v3 }
  0x12   :  { %100 = vmatpush.msra.mxu0 %v95_v4 }
  0x14   :  { %101 = vmatpush.msra.mxu0 %v94_v5 }
  0x15   :  { %74 = vperm.xlu0 %2234, %v67_v6  }
  0x16   :  { %102 = vmatpush.msra.mxu0 %v93_v7 }
  0x17   :  { %25 = vsyncpa [#allocation3], 0  ;;  %v90_v10 = vld [vmem:[%s3368_s13 + $0x40] sm:$0xff]  ;;  %v89_v11 = vld [vmem:[%s3368_s13 + $0x38] sm:$0xff]  ;;  %v68_v19 = vlaneseq  ;;  %v2431_v22 = vmov 1.0   ;;  %vm127_vm2 = vcmask 261120  }
  0x18   :  { %103 = vmatpush.msra.mxu0 %v92_v8  ;;  %v88_v12 = vld [vmem:[%s3368_s13 + $0x30] sm:$0xff]  ;;  %v87_v13 = vld [vmem:[%s3368_s13 + $0x28] sm:$0xff]  ;;  %v86_v14 = vld [vmem:[%s3368_s13 + $0x20] sm:$0xff]  ;;  %v2432_v28 = vmov 32.0   ;;  %s3369_s24 = sld [smem:[#allocation6_spill]]  ;;  %s2433_s25 = smov 32  }
  0x19   :  { %v85_v15 = vld [vmem:[%s3368_s13 + $0x18] sm:$0xff]  ;;  %v84_v16 = vld [vmem:[%s3368_s13 + $0x10] sm:$0xff]  ;;  %v83_v17 = vld [vmem:[%s3368_s13 + $0x8] sm:$0xff]  ;;  %v2600_v20 = vand.u32 127, %v68_v19  ;;  %2310 = vrcp.f32 %v2432_v28  ;;  %s3370_s29 = sld [smem:[#allocation7_spill]]  ;;  %s3358_s0 = smov 96  }
  0x1a   :  { %104 = vmatpush.msra.mxu0 %v91_v9  ;;  %v82_v18 = vld [vmem:[%s3368_s13] sm:$0xff]  ;;  %v195_v45 = vld [vmem:[%s3329_s4 + $0x30] sm:$0xff]  ;;  %v196_v49 = vld [vmem:[%s3329_s4 + $0x38] sm:$0xff]  ;;  %s2435_s3 = smov 112   ;;  %s2436_s26 = smov 120   ;;  %vm343_vm10 = vcmask 64512  }
  0x1b   :  { %2215 = vmatpush.msra.mxu2 %v195_v45  ;;  %221 = vmatpush.msra.mxu1 %v195_v45  ;;  %v193_v46 = vld [vmem:[%s3329_s4 + $0x20] sm:$0xff]  ;;  %v191_v47 = vld [vmem:[%s3329_s4 + $0x10] sm:$0xff]  ;;  %v194_v50 = vld [vmem:[%s3329_s4 + $0x28] sm:$0xff]  ;;  %s3360_s27 = smov 104   ;;  %s3354_s28 = smov 64   ;;  %vm872_vm12 = vcmask 130048  }
  0x1c   :  { %105 = vmatpush.msra.mxu0 %v90_v10  ;;  %v189_v48 = vld [vmem:[%s3329_s4] sm:$0xff]  ;;  %v192_v51 = vld [vmem:[%s3329_s4 + $0x18] sm:$0xff]  ;;  %v190_v54 = vld [vmem:[%s3329_s4 + $0x8] sm:$0xff]  ;;  %s3350_s30 = smov 8   ;;  %s3352_s21 = smov 16   ;;  %vm875_vm13 = vcmask 195584  }
  0x1d   :  { %2216 = vmatpush.msra.mxu2 %v193_v46  ;;  %222 = vmatpush.msra.mxu1 %v193_v46  ;;  %v2295_v6 = vld [vmem:[%s3333_s8] ss:$0 sm:$0xff]  ;;  %s3356_s1 = smov 24   ;;  %s3371_s20 = sld [smem:[#allocation9_spill]] }
  0x1e   :  { %106 = vmatpush.msra.mxu0 %v89_v11  ;;  %v2652_v56 = vld [vmem:[%s3369_s24] sm:$0xff]  ;;  %v2660_v62 = vld [vmem:[%s3369_s24 + $0x8] sm:$0xff] }
  0x1f   :  { %v2311_v29 = vpop.eup %2310  ;;  %2217 = vmatpush.msra.mxu2 %v191_v47  ;;  %223 = vmatpush.msra.mxu1 %v191_v47  ;;  %v64_v63 = vld [vmem:[%s3370_s29] sm:$0xff] }
  0x20   :  { %107 = vmatpush.msra.mxu0 %v88_v12  ;;  %v135_v30 = vmul.f32 32.0, %v2311_v29  ;;  %vm139_vm3 = vweird.f32 %v2311_v29  ;;  %279 = vrot.lane.b32.xlu0 %v2652_v56, %s2433_s25  ;;  %v2296_v10 = vld [vmem:[%s3334_s9] ss:$0 sm:$0xff] }
  0x21   :  { %2218 = vmatpush.msra.mxu2 %v189_v48  ;;  %224 = vmatpush.msra.mxu1 %v189_v48 }
  0x22   :  { %108 = vmatpush.msra.mxu0 %v87_v13  ;;  %v136_v31 = vsub.f32 1.0, %v135_v30 }
  0x23   :  { %244 = vmatpush.msrb.mxu2 %v196_v49 }
  0x24   :  { %109 = vmatpush.msra.mxu0 %v86_v14  ;;  %v137_v32 = vmul.f32 %v2311_v29, %v136_v31 }
  0x25   :  { %245 = vmatpush.msrb.mxu2 %v194_v50 }
  0x26   :  { %110 = vmatpush.msra.mxu0 %v85_v15  ;;  %v138_v33 = vadd.f32 %v2311_v29, %v137_v32 }
  0x27   :  { %246 = vmatpush.msrb.mxu2 %v192_v51 }
  0x28   :  { %111 = vmatpush.msra.mxu0 %v84_v16  ;;  %v2612_v34 = vsel %vm139_vm3, %v2311_v29, %v138_v33  ;;  %281 = vrot.lane.b32.xlu0 %v2660_v62, %s2433_s25 }
  0x29   :  { %247 = vmatpush.msrb.mxu2 %v190_v54 }
  0x2a   :  { %112 = vmatpush.msra.mxu0 %v83_v17 }
  0x2c   :  { %113 = vmatpush.msra.mxu0 %v82_v18 }
  0x7f   :  { %v72_v21 = vpop.permute.xlu0 %71 }
  0x80   :  { %vm76_vm0 = vcmp.eq.s32.totalorder %v2600_v20, %v72_v21 }
  0x81   :  { %2107 = vmatmul.msk.f32.vlgmr.msra.gmra.mxu0 %vm76_vm0, %v2431_v22 }
  0x87   :  { %v75_v23 = vpop.permute.xlu0 %74 }
  0x88   :  { %vm77_vm1 = vcmp.eq.s32.totalorder %v2600_v20, %v75_v23 }
  0x89   :  { %2108 = vmatmul.msk.f32.gmra.mxu0 %vm77_vm1, %v2431_v22  ;;  %v197_v22 = vld [vmem:[%s3330_s5] sm:$0x3] }
  0x8a   :  { %v199_v23 = vperm.slane %v197_v22, 0  ;;  %v200_v28 = vperm.slane %v197_v22, 1 }
  0xfe   :  { %v2604_v24 = vpop.f32.mrf.mxu0 }
  0xff   :  { %v128_v27 = vsel %vm127_vm2, %v2604_v24, 0.0 }
 0x106   :  { %v2606_v25 = vpop.f32.mrf.mxu0 }
 0x107   :  { %v131_v26 = vsel %vm127_vm2, %v2606_v25, 0.0 }
 0x108   :  { %132 = vadd.xlane.f32.xlu1 %v131_v26 }
 0x110   :  { %129 = vadd.xlane.f32.xlu1 %v128_v27 }
 0x17b   :  { %v133_v35 = vpop.xlane.xlu1 %132 }
 0x17c   :  { %v142_v36 = vmul.f32 %v2612_v34, %v133_v35 }
 0x17e   :  { %v144_v37 = vsub.f32 %v2606_v25, %v142_v36  ;;  %v65_v36 = vld [vmem:[%s3370_s29 + $0x8] sm:$0xff] }
 0x180   :  { %v146_v38 = vmul.f32 %v144_v37, %v144_v37 }
 0x182   :  { %v150_v39 = vsel %vm127_vm2, %v146_v38, 0.0 }
 0x183   :  { %151 = vadd.xlane.f32.xlu2 %v150_v39  ;;  %v130_v40 = vpop.xlane.xlu1 %129 }
 0x184   :  { %v141_v41 = vmul.f32 %v2612_v34, %v130_v40 }
 0x186   :  { %v2619_v42 = vsub.f32 %v2604_v24, %v141_v41  ;;  %v2697_v41 = vpop.permute.xlu0 %279 }
 0x188   :  { %v145_v43 = vmul.f32 %v2619_v42, %v2619_v42 }
 0x18a   :  { %v147_v44 = vsel %vm127_vm2, %v145_v43, 0.0 }
 0x18b   :  { %148 = vadd.xlane.f32.xlu2 %v147_v44 }
 0x18e   :  { %v2701_v43 = vpop.permute.xlu0 %281 }
 0x1a3   :  { %259 = vrot.lane.b32.xlu2 %v64_v63, %s3358_s0 }
 0x1f6   :  { %v152_v52 = vpop.xlane.xlu2 %151 }
 0x1f7   :  { %v154_v53 = vmul.f32 %v152_v52, %v2612_v34 }
 0x1f9   :  { %v156_v55 = vadd.f32 1e-05, %v154_v53 }
 0x1fb   :  { %2312 = vrsqrt.f32 %v156_v55  ;;  %vm173_vm5 = vweird.f32 %v156_v55 }
 0x1fe   :  { %v149_v57 = vpop.xlane.xlu2 %148 }
 0x1ff   :  { %v153_v58 = vmul.f32 %v149_v57, %v2612_v34 }
 0x201   :  { %v2313_v59 = vpop.eup %2312  ;;  %v155_v60 = vadd.f32 1e-05, %v153_v58 }
 0x202   :  { %v168_v61 = vmul.f32 %v2313_v59, %v156_v55  ;;  %vm174_vm4 = vweird.f32 %v2313_v59 }
 0x203   :  { %2314 = vrsqrt.f32 %v155_v60  ;;  %vm175_vm6 = vmor %vm173_vm5, %vm174_vm4  ;;  %vm163_vm8 = vweird.f32 %v155_v60 }
 0x204   :  { %v169_v0 = vmul.f32 %v2313_v59, %v168_v61 }
 0x206   :  { %v170_v1 = vmul.f32 0.5, %v169_v0  ;;  %v2687_v35 = vpop.permute.xlu2 %259 }
 0x208   :  { %v171_v2 = vsub.f32 1.5, %v170_v1 }
 0x209   :  { %v2315_v3 = vpop.eup %2314 }
 0x20a   :  { %v172_v4 = vmul.f32 %v2313_v59, %v171_v2  ;;  %v158_v5 = vmul.f32 %v2315_v3, %v155_v60  ;;  %vm164_vm7 = vweird.f32 %v2315_v3 }
 0x20b   :  { %vm165_vm9 = vmor %vm163_vm8, %vm164_vm7 }
 0x20c   :  { %v176_v7 = vsel %vm175_vm6, %v2313_v59, %v172_v4  ;;  %v159_v8 = vmul.f32 %v2315_v3, %v158_v5 }
 0x20d   :  { %v178_v9 = vmul.f32 %v176_v7, %v144_v37 }
 0x20e   :  { %v160_v11 = vmul.f32 0.5, %v159_v8 }
 0x20f   :  { %v183_v12 = vmul.f32 %v2295_v6, %v178_v9 }
 0x210   :  { %v161_v13 = vsub.f32 1.5, %v160_v11 }
 0x211   :  { %v188_v14 = vadd.f32 %v2296_v10, %v183_v12 }
 0x212   :  { %v162_v15 = vmul.f32 %v2315_v3, %v161_v13 }
 0x213   :  { %2110 = vmatmul.msk.f32.vlgmr.msra.gmra.mxu2 %vm127_vm2, %v188_v14 }
 0x214   :  { %v166_v16 = vsel %vm165_vm9, %v2315_v3, %v162_v15  ;;  %v2438_v15 = vmov -1e+09  }
 0x215   :  { %v177_v17 = vmul.f32 %v166_v16, %v2619_v42 }
 0x217   :  { %v182_v18 = vmul.f32 %v2295_v6, %v177_v17 }
 0x219   :  { %v187_v21 = vadd.f32 %v2296_v10, %v182_v18 }
 0x21b   :  { %2109 = vmatmul.msk.f32.vlgmr.msra.gmra.mxu1 %vm127_vm2, %v187_v21  ;;  %2111 = vmatmul.msk.f32.vlgmr.msrb.gmra.mxu2 %vm127_vm2, %v187_v21 }
 0x223   :  { %2112 = vmatmul.msk.f32.gmra.mxu2 %vm127_vm2, %v188_v14  ;;  %v122_v14 = vshrl.u32 %v68_v19, 7 }
 0x225   :  { %vm123_vm11 = vcmp.ge.s32.totalorder %v122_v14, %v2600_v20 }
 0x226   :  { %v2763_v16 = vsel %vm123_vm11, 0.0, %v2438_v15 }
 0x296   :  { %v229_v26 = vpop.f32.mrf.mxu2 }
 0x297   :  { %v2682_v27 = vadd.f32 %v229_v26, %v199_v23 }
 0x298   :  { %v226_v32 = vpop.f32.mrf.mxu1 }
 0x299   :  { %v2685_v33 = vadd.f32 %v226_v32, %v199_v23  ;;  %v286_v46 = vmul.f32 %v2701_v43, %v2682_v27  ;;  %v256_v55 = vmul.f32 %v2682_v27, %v2660_v62 }
 0x29b   :  { %v265_v39 = vmul.f32 %v2687_v35, %v2685_v33  ;;  %v285_v42 = vmul.f32 %v2697_v41, %v2685_v33  ;;  %v255_v52 = vmul.f32 %v2685_v33, %v2652_v56  ;;  %v2235_v62 = vpack.i.bf16 %v2682_v27, %v2685_v33 }
 0x29e   :  { %v249_v29 = vpop.f32.mrf.mxu2 }
 0x29f   :  { %v250_v30 = vadd.f32 %v249_v29, %v200_v28 }
 0x2a1   :  { %v287_v31 = vmul.f32 %v250_v30, %v64_v63 }
 0x2a3   :  { %291 = vrot.lane.b32.xlu1 %v287_v31, %s2433_s25 }
 0x2a6   :  { %v252_v37 = vpop.f32.mrf.mxu2 }
 0x2a7   :  { %v253_v38 = vadd.f32 %v252_v37, %v200_v28 }
 0x2a9   :  { %v288_v40 = vmul.f32 %v253_v38, %v65_v36 }
 0x2ab   :  { %269 = vrot.lane.b32.xlu1 %v265_v39, %s2433_s25  ;;  %293 = vrot.lane.b32.xlu0 %v288_v40, %s2433_s25 }
 0x2b3   :  { %261 = vrot.lane.b32.xlu0 %v65_v36, %s3358_s0 }
 0x315   :  { %v292_v44 = vpop.permute.xlu1 %291 }
 0x316   :  { %v297_v45 = vadd.f32 %v292_v44, %v285_v42 }
 0x318   :  { %319 = vrot.lane.b32.xlu1 %v297_v45, %s2435_s3  ;;  %315 = vrot.lane.b32.xlu2 %v297_v45, %s2436_s26 }
 0x31d   :  { %v294_v47 = vpop.permute.xlu0 %293  ;;  %v270_v51 = vpop.permute.xlu1 %269 }
 0x31e   :  { %v298_v48 = vadd.f32 %v294_v47, %v286_v46  ;;  %v275_v53 = vadd.f32 %v270_v51, %v255_v52 }
 0x320   :  { %321 = vrot.lane.b32.xlu1 %v298_v48, %s2435_s3  ;;  %317 = vrot.lane.b32.xlu0 %v298_v48, %s2436_s26 }
 0x325   :  { %v2709_v49 = vpop.permute.xlu0 %261 }
 0x326   :  { %v266_v50 = vmul.f32 %v2709_v49, %v2682_v27 }
 0x328   :  { %323 = vrot.lane.b32.xlu0 %v297_v45, %s3360_s27  ;;  %271 = vrot.lane.b32.xlu2 %v266_v50, %s2433_s25 }
 0x330   :  { %341 = vrot.lane.b32.xlu0 %v297_v45, %s3358_s0  ;;  %325 = vrot.lane.b32.xlu2 %v298_v48, %s3360_s27 }
 0x338   :  { %368 = vrot.lane.b32.xlu2 %v298_v48, %s3358_s0  ;;  %301 = vrot.lane.b32.xlu0 %v275_v53, %s2436_s26 }
 0x372   :  { %v316_v54 = vpop.permute.xlu2 %315 }
 0x373   :  { %394 = vrot.lane.b32.xlu1 %v316_v54, %s3358_s0 }
 0x382   :  { %v272_v57 = vpop.permute.xlu2 %271 }
 0x383   :  { %v276_v58 = vadd.f32 %v272_v57, %v256_v55 }
 0x385   :  { %303 = vrot.lane.b32.xlu0 %v276_v58, %s2436_s26 }
 0x38a   :  { %v320_v59 = vpop.permute.xlu1 %319  ;;  %v326_v60 = vpop.permute.xlu2 %325 }
 0x38b   :  { %446 = vrot.lane.b32.xlu1 %v320_v59, %s3358_s0 }
 0x38d   :  { %524 = vrot.lane.b32.xlu0 %v326_v60, %s3358_s0 }
 0x392   :  { %v318_v56 = vpop.permute.xlu0 %317  ;;  %v322_v61 = vpop.permute.xlu1 %321 }
 0x393   :  { %420 = vrot.lane.b32.xlu2 %v318_v56, %s3358_s0  ;;  %v2736_v1 = vpop.permute.xlu2 %368 }
 0x395   :  { %472 = vrot.lane.b32.xlu0 %v322_v61, %s3358_s0 }
 0x39a   :  { %v324_v63 = vpop.permute.xlu0 %323 }
 0x39b   :  { %498 = vrot.lane.b32.xlu1 %v324_v63, %s3358_s0  ;;  %305 = vrot.lane.b32.xlu2 %v275_v53, %s2435_s3  ;;  %s2444_s0 = smov 128  }
 0x39d   :  { %2236 = vrot.lane.b32.xlu0 %v2235_v62, %s2436_s26 }
 0x3a2   :  { %v2734_v0 = vpop.permute.xlu0 %341 }
 0x3a3   :  { %311 = vrot.lane.b32.xlu1 %v276_v58, %s3360_s27  ;;  %2113 = vmatpush.xpose.msk.msra.mxu3 %vm343_vm10, %v2734_v0 }
 0x3a4   :  { %309 = vrot.lane.b32.xlu2 %v275_v53, %s3360_s27 }
 0x3a6   :  { %2114 = vmatmul.msk.f32.vlgmr.msra.gmra.mxu3 %vm343_vm10, %v275_v53 }
 0x3a7   :  { %2115 = vmatpush.xpose.msk.msrb.mxu3 %vm343_vm10, %v2736_v1 }
 0x3aa   :  { %v302_v3 = vpop.permute.xlu0 %301 }
 0x3ab   :  { %2241 = vrot.lane.b32.xlu1 %v2235_v62, %s3360_s27  ;;  %s3377_s27 = smov 24  }
 0x3ac   :  { %307 = vrot.lane.b32.xlu2 %v276_v58, %s2435_s3 }
 0x3ae   :  { %2116 = vmatmul.msk.f32.vlgmr.msrb.gmra.mxu3 %vm343_vm10, %v276_v58 }
 0x3b4   :  { %2246 = vrot.lane.b32.xlu2 %v2235_v62, %s2435_s3 }
 0x3e5   :  { %v395_v2 = vpop.permute.xlu1 %394 }
 0x3e6   :  { %2117 = vmatpush.xpose.msk.msra.mxu3 %vm343_vm10, %v395_v2 }
 0x3e9   :  { %2118 = vmatmul.msk.f32.vlgmr.msra.gmra.mxu3 %vm343_vm10, %v302_v3 }
 0x3ed   :  { %v421_v4 = vpop.permute.xlu2 %420 }
 0x3ee   :  { %2119 = vmatpush.xpose.msk.msrb.mxu1 %vm343_vm10, %v421_v4 }
 0x3f5   :  { %v306_v5 = vpop.permute.xlu2 %305 }
 0x3f7   :  { %v304_v6 = vpop.permute.xlu0 %303 }
 0x3f8   :  { %2120 = vmatmul.msk.f32.vlgmr.msrb.gmra.mxu1 %vm343_vm10, %v304_v6 }
 0x3fd   :  { %v447_v7 = vpop.permute.xlu1 %446 }
 0x3fe   :  { %2121 = vmatpush.xpose.msk.msra.mxu2 %vm343_vm10, %v447_v7  ;;  %v310_v9 = vpop.permute.xlu2 %309 }
 0x3ff   :  { %v525_v8 = vpop.permute.xlu0 %524 }
 0x401   :  { %2122 = vmatmul.msk.f32.vlgmr.msra.gmra.mxu2 %vm343_vm10, %v306_v5 }
 0x402   :  { %2127 = vmatpush.xpose.msk.msrb.mxu2 %vm343_vm10, %v525_v8 }
 0x406   :  { %v308_v11 = vpop.permute.xlu2 %307 }
 0x407   :  { %v473_v10 = vpop.permute.xlu0 %472 }
 0x408   :  { %2123 = vmatpush.xpose.msk.msrb.mxu3 %vm343_vm10, %v473_v10 }
 0x40b   :  { %2124 = vmatmul.msk.f32.vlgmr.msrb.gmra.mxu3 %vm343_vm10, %v308_v11 }
 0x40d   :  { %v499_v12 = vpop.permute.xlu1 %498 }
 0x40e   :  { %2125 = vmatpush.xpose.msk.msra.mxu1 %vm343_vm10, %v499_v12  ;;  %v2247_v48 = vpop.permute.xlu2 %2246 }
 0x40f   :  { %v2237_v63 = vpop.permute.xlu0 %2236  ;;  %v2248_v14 = vunpack.i.l.bf16 %v2247_v48 }
 0x410   :  { %v2238_v62 = vunpack.i.l.bf16 %v2237_v63 }
 0x411   :  { %2126 = vmatmul.msk.f32.vlgmr.msra.gmra.mxu1 %vm343_vm10, %v310_v9 }
 0x412   :  { %v2250_v2 = vpack.i.bf16 %v2238_v62, %v2685_v33 }
 0x415   :  { %v312_v13 = vpop.permute.xlu1 %311 }
 0x416   :  { %2128 = vmatmul.msk.f32.vlgmr.msrb.gmra.mxu2 %vm343_vm10, %v312_v13 }
 0x41d   :  { %v2780_v42 = vpop.permute.xlu1 %2241 }
 0x429   :  { %v365_v17 = vpop.f32.mrf.mxu3 }
 0x42a   :  { %v366_v18 = vadd.f32 %v365_v17, %v2763_v16  ;;  %v2260_v17 = vpack.i.bf16 %v2248_v14, %v2682_v27 }
 0x42c   :  { %v550_v21 = vsel %vm343_vm10, %v366_v18, -inf }
 0x42d   :  { %551 = vmax.xlane.f32.xlu1 %v550_v21 }
 0x431   :  { %v391_v22 = vpop.f32.mrf.mxu3 }
 0x432   :  { %v392_v23 = vadd.f32 %v391_v22, %v2763_v16  ;;  %v2249_v22 = vunpack.i.h.bf16 %v2247_v48 }
 0x434   :  { %v553_v26 = vsel %vm343_vm10, %v392_v23, -inf }
 0x435   :  { %554 = vmax.xlane.f32.xlu2 %v553_v26 }
 0x46c   :  { %v417_v28 = vpop.f32.mrf.mxu3 }
 0x46d   :  { %v418_v19 = vadd.f32 %v417_v28, %v2763_v16 }
 0x46f   :  { %v556_v20 = vsel %vm343_vm10, %v418_v19, -inf }
 0x470   :  { %557 = vmax.xlane.f32.xlu0 %v556_v20 }
 0x475   :  { %v443_v29 = vpop.f32.mrf.mxu1 }
 0x476   :  { %v444_v30 = vadd.f32 %v443_v29, %v2763_v16 }
 0x478   :  { %v559_v31 = vsel %vm343_vm10, %v444_v30, -inf }
 0x479   :  { %560 = vmax.xlane.f32.xlu2 %v559_v31 }
 0x484   :  { %v469_v32 = vpop.f32.mrf.mxu2 }
 0x485   :  { %v470_v36 = vadd.f32 %v469_v32, %v2763_v16 }
 0x487   :  { %v562_v37 = vsel %vm343_vm10, %v470_v36, -inf }
 0x488   :  { %563 = vmax.xlane.f32.xlu0 %v562_v37 }
 0x48e   :  { %v495_v38 = vpop.f32.mrf.mxu3  ;;  %v521_v47 = vpop.f32.mrf.mxu1 }
 0x48f   :  { %v2776_v39 = vadd.f32 %v495_v38, %v2763_v16  ;;  %v522_v50 = vadd.f32 %v521_v47, %v2763_v16 }
 0x491   :  { %v565_v40 = vsel %vm343_vm10, %v2776_v39, -inf  ;;  %v568_v54 = vsel %vm343_vm10, %v522_v50, -inf }
 0x492   :  { %566 = vmax.xlane.f32.xlu2 %v565_v40 }
 0x499   :  { %v547_v44 = vpop.f32.mrf.mxu2 }
 0x49a   :  { %v548_v45 = vadd.f32 %v547_v44, %v2763_v16  ;;  %v2243_v44 = vunpack.i.l.bf16 %v2780_v42 }
 0x49c   :  { %v571_v46 = vsel %vm343_vm10, %v548_v45, -inf }
 0x49d   :  { %572 = vmax.xlane.f32.xlu1 %v571_v46  ;;  %v2239_v46 = vunpack.i.h.bf16 %v2237_v63 }
 0x4a0   :  { %v552_v51 = vpop.xlane.xlu1 %551 }
 0x4a1   :  { %v574_v52 = vsub.f32 %v366_v18, %v552_v51 }
 0x4a3   :  { %v582_v53 = vmul.f32 1.442695, %v574_v52 }
 0x4a5   :  { %2316 = vpow2.f32 %v582_v53  ;;  %569 = vmax.xlane.f32.xlu1 %v568_v54 }
 0x4a8   :  { %v555_v55 = vpop.xlane.xlu2 %554 }
 0x4a9   :  { %v575_v57 = vsub.f32 %v392_v23, %v555_v55 }
 0x4ab   :  { %v2786_v58 = vpop.eup %2316  ;;  %v584_v59 = vmul.f32 1.442695, %v575_v57  ;;  %v2244_v57 = vunpack.i.h.bf16 %v2780_v42 }
 0x4ac   :  { %v598_v60 = vsel %vm343_vm10, %v2786_v58, 0.0 }
 0x4ad   :  { %2318 = vpow2.f32 %v584_v59  ;;  %599 = vadd.xlane.f32.xlu0 %v598_v60 }
 0x4b3   :  { %v2790_v56 = vpop.eup %2318 }
 0x4b4   :  { %v601_v61 = vsel %vm343_vm10, %v2790_v56, 0.0 }
 0x4b5   :  { %602 = vadd.xlane.f32.xlu0 %v601_v61 }
 0x4be   :  { %2251 = vrot.lane.b32.xlu1 %v2250_v2, %s3354_s28 }
 0x4e3   :  { %v558_v3 = vpop.xlane.xlu0 %557 }
 0x4e4   :  { %v576_v4 = vsub.f32 %v418_v19, %v558_v3 }
 0x4e6   :  { %v586_v5 = vmul.f32 1.442695, %v576_v4 }
 0x4e8   :  { %2320 = vpow2.f32 %v586_v5 }
 0x4ec   :  { %v561_v8 = vpop.xlane.xlu2 %560 }
 0x4ed   :  { %v577_v11 = vsub.f32 %v444_v30, %v561_v8 }
 0x4ee   :  { %v2321_v6 = vpop.eup %2320 }
 0x4ef   :  { %v604_v7 = vsel %vm343_vm10, %v2321_v6, 0.0  ;;  %v588_v13 = vmul.f32 1.442695, %v577_v11 }
 0x4f0   :  { %605 = vadd.xlane.f32.xlu1 %v604_v7 }
 0x4fb   :  { %v564_v9 = vpop.xlane.xlu0 %563 }
 0x4fc   :  { %v578_v10 = vsub.f32 %v470_v36, %v564_v9 }
 0x4fe   :  { %v590_v12 = vmul.f32 1.442695, %v578_v10 }
 0x500   :  { %2322 = vpow2.f32 %v590_v12 }
 0x501   :  { %2324 = vpow2.f32 %v588_v13 }
 0x505   :  { %v567_v26 = vpop.xlane.xlu2 %566 }
 0x506   :  { %v2797_v15 = vpop.eup %2322  ;;  %v579_v20 = vsub.f32 %v2776_v39, %v567_v26 }
 0x507   :  { %v610_v18 = vsel %vm343_vm10, %v2797_v15, 0.0  ;;  %v2803_v21 = vpop.eup %2324 }
 0x508   :  { %611 = vadd.xlane.f32.xlu2 %v610_v18  ;;  %v607_v23 = vsel %vm343_vm10, %v2803_v21, 0.0  ;;  %v592_v30 = vmul.f32 1.442695, %v579_v20 }
 0x509   :  { %2261 = vrot.lane.b32.xlu1 %v2260_v17, %s3354_s28 }
 0x510   :  { %608 = vadd.xlane.f32.xlu2 %v607_v23  ;;  %v573_v28 = vpop.xlane.xlu1 %572 }
 0x511   :  { %768 = vrot.lane.b32.xlu1 %v2249_v22, %s3354_s28  ;;  %v581_v19 = vsub.f32 %v548_v45, %v573_v28  ;;  %v2255_v45 = vpack.i.bf16 %v2243_v44, %v2239_v46  ;;  %v879_v44 = vld [vmem:[%s3331_s6 + $0x8] sm:$0xff]  ;;  %v878_v46 = vld [vmem:[%s3331_s6] sm:$0xff] }
 0x513   :  { %v596_v29 = vmul.f32 1.442695, %v581_v19 }
 0x515   :  { %2326 = vpow2.f32 %v596_v29 }
 0x516   :  { %2328 = vpow2.f32 %v592_v30 }
 0x518   :  { %v570_v31 = vpop.xlane.xlu1 %569 }
 0x519   :  { %v580_v36 = vsub.f32 %v522_v50, %v570_v31 }
 0x51b   :  { %v2809_v32 = vpop.eup %2326  ;;  %v594_v38 = vmul.f32 1.442695, %v580_v36 }
 0x51c   :  { %v619_v37 = vsel %vm343_vm10, %v2809_v32, 0.0  ;;  %v2329_v40 = vpop.eup %2328 }
 0x51d   :  { %620 = vadd.xlane.f32.xlu0 %v619_v37  ;;  %2330 = vpow2.f32 %v594_v38  ;;  %v613_v39 = vsel %vm343_vm10, %v2329_v40, 0.0  ;;  %v881_v38 = vld [vmem:[%s3331_s6 + $0x18] sm:$0xff] }
 0x520   :  { %v600_v47 = vpop.xlane.xlu0 %599 }
 0x521   :  { %2332 = vrcp.f32 %v600_v47 }
 0x523   :  { %v2331_v48 = vpop.eup %2330 }
 0x524   :  { %v616_v50 = vsel %vm343_vm10, %v2331_v48, 0.0 }
 0x525   :  { %614 = vadd.xlane.f32.xlu0 %v613_v39 }
 0x527   :  { %v2333_v51 = vpop.eup %2332 }
 0x528   :  { %2256 = vrot.lane.b32.xlu2 %v2255_v45, %s3354_s28  ;;  %v630_v55 = vmul.f32 %v2333_v51, %v2786_v58  ;;  %v603_v63 = vpop.xlane.xlu0 %602 }
 0x52d   :  { %617 = vadd.xlane.f32.xlu0 %v616_v50 }
 0x530   :  { %v2252_v52 = vpop.permute.xlu1 %2251 }
 0x531   :  { %v2254_v53 = vunpack.i.h.bf16 %v2252_v52  ;;  %v2253_v54 = vunpack.i.l.bf16 %v2252_v52 }
 0x533   :  { %659 = vmatpush.msra.mxu3 %v2253_v54  ;;  %711 = vmatpush.msra.mxu2 %v2254_v53 }
 0x534   :  { %2129 = vmatmul.msk.f32.vlgmr.msra.gmra.mxu3 %vm343_vm10, %v630_v55 }
 0x541   :  { %820 = vrot.lane.b32.xlu0 %v2244_v57, %s3354_s28 }
 0x563   :  { %v606_v59 = vpop.xlane.xlu1 %605 }
 0x564   :  { %2334 = vrcp.f32 %v606_v59 }
 0x565   :  { %2336 = vrcp.f32 %v603_v63 }
 0x56a   :  { %v2335_v60 = vpop.eup %2334 }
 0x56b   :  { %v632_v61 = vmul.f32 %v2335_v60, %v2321_v6  ;;  %v2337_v62 = vpop.eup %2336  ;;  %v2297_v60 = vld [vmem:[%s3332_s7] ss:$0 sm:$0xff] }
 0x56c   :  { %v631_v5 = vmul.f32 %v2337_v62, %v2790_v56 }
 0x56d   :  { %2131 = vmatmul.msk.f32.vlgmr.msra.gmra.mxu2 %vm343_vm10, %v632_v61 }
 0x57b   :  { %v612_v2 = vpop.xlane.xlu2 %611  ;;  %v2262_v3 = vpop.permute.xlu1 %2261 }
 0x57c   :  { %2338 = vrcp.f32 %v612_v2  ;;  %v2263_v58 = vunpack.i.l.bf16 %v2262_v3  ;;  %v2264_v4 = vunpack.i.h.bf16 %v2262_v3 }
 0x57e   :  { %685 = vmatpush.msrb.mxu1 %v2263_v58  ;;  %763 = vmatpush.msrb.mxu0 %v2264_v4 }
 0x57f   :  { %2130 = vmatmul.msk.f32.vlgmr.msrb.gmra.mxu1 %vm343_vm10, %v631_v5 }
 0x580   :  { %900 = vmatpush.msra.mxu0 %v881_v38 }
 0x582   :  { %v2339_v42 = vpop.eup %2338 }
 0x583   :  { %v609_v7 = vpop.xlane.xlu2 %608  ;;  %v769_v8 = vpop.permute.xlu1 %768  ;;  %v634_v6 = vmul.f32 %v2339_v42, %v2797_v15 }
 0x584   :  { %2340 = vrcp.f32 %v609_v7  ;;  %789 = vmatpush.msra.mxu1 %v769_v8 }
 0x585   :  { %2133 = vmatmul.msk.f32.vlgmr.msrb.gmra.mxu0 %vm343_vm10, %v634_v6 }
 0x58a   :  { %v2341_v9 = vpop.eup %2340 }
 0x58b   :  { %v2257_v10 = vpop.permute.xlu2 %2256  ;;  %v633_v13 = vmul.f32 %v2341_v9, %v2803_v21 }
 0x58c   :  { %v2259_v11 = vunpack.i.h.bf16 %v2257_v10  ;;  %v2258_v12 = vunpack.i.l.bf16 %v2257_v10 }
 0x58e   :  { %737 = vmatpush.msrb.mxu3 %v2258_v12  ;;  %815 = vmatpush.msrb.mxu2 %v2259_v11 }
 0x58f   :  { %2132 = vmatmul.msk.f32.vlgmr.msrb.gmra.mxu3 %vm343_vm10, %v633_v13  ;;  %v978_v13 = vld [vmem:[%s3337_s12 + $0x18] sm:$0xff] }
 0x590   :  { %v621_v56 = vpop.xlane.xlu0 %620  ;;  %1001 = vmatpush.msrb.mxu1 %v978_v13 }
 0x598   :  { %v615_v14 = vpop.xlane.xlu0 %614 }
 0x599   :  { %2342 = vrcp.f32 %v615_v14  ;;  %v976_v14 = vld [vmem:[%s3337_s12 + $0x8] sm:$0xff] }
 0x59f   :  { %v2343_v17 = vpop.eup %2342 }
 0x5a0   :  { %v635_v18 = vmul.f32 %v2343_v17, %v2329_v40  ;;  %v618_v15 = vpop.xlane.xlu0 %617  ;;  %v880_v40 = vld [vmem:[%s3331_s6 + $0x10] sm:$0xff]  ;;  %v975_v17 = vld [vmem:[%s3337_s12] sm:$0xff] }
 0x5a1   :  { %2344 = vrcp.f32 %v618_v15  ;;  %901 = vmatpush.msra.mxu0 %v880_v40  ;;  %v2298_v40 = vld [vmem:[%s3335_s10] ss:$0 sm:$0xff] }
 0x5a2   :  { %2134 = vmatmul.msk.f32.vlgmr.msra.gmra.mxu1 %vm343_vm10, %v635_v18  ;;  %2346 = vrcp.f32 %v621_v56  ;;  %v977_v56 = vld [vmem:[%s3337_s12 + $0x10] sm:$0xff] }
 0x5a3   :  { %902 = vmatpush.msra.mxu0 %v879_v44  ;;  %1002 = vmatpush.msrb.mxu1 %v977_v56 }
 0x5a5   :  { %903 = vmatpush.msra.mxu0 %v878_v46  ;;  %1003 = vmatpush.msrb.mxu1 %v976_v14 }
 0x5a7   :  { %v2345_v22 = vpop.eup %2344  ;;  %1004 = vmatpush.msrb.mxu1 %v975_v17 }
 0x5a8   :  { %v636_v23 = vmul.f32 %v2345_v22, %v2331_v48  ;;  %v2347_v26 = vpop.eup %2346 }
 0x5a9   :  { %v637_v21 = vmul.f32 %v2347_v26, %v2809_v32  ;;  %v1044_v26 = vld [vmem:[%s3339_s14 + $0x70] sm:$0xff] }
 0x5aa   :  { %2135 = vmatmul.msk.f32.vlgmr.msrb.gmra.mxu2 %vm343_vm10, %v636_v23  ;;  %v1045_v23 = vld [vmem:[%s3339_s14 + $0x78] sm:$0xff] }
 0x5ab   :  { %1046 = vmatpush.msra.mxu2 %v1045_v23 }
 0x5ad   :  { %1047 = vmatpush.msra.mxu2 %v1044_v26 }
 0x5b3   :  { %v821_v28 = vpop.permute.xlu0 %820 }
 0x5b4   :  { %841 = vmatpush.msra.mxu3 %v821_v28 }
 0x5b5   :  { %2136 = vmatmul.msk.f32.vlgmr.msra.gmra.mxu3 %vm343_vm10, %v637_v21  ;;  %v1043_v21 = vld [vmem:[%s3339_s14 + $0x68] sm:$0xff] }
 0x5b6   :  { %1048 = vmatpush.msra.mxu2 %v1043_v21 }
 0x5b7   :  { %v661_v29 = vpop.f32.mrf.mxu3 }
 0x5f0   :  { %v713_v19 = vpop.f32.mrf.mxu2 }
 0x5f1   :  { %848 = vrot.lane.b32.xlu2 %v713_v19, %s3350_s30 }
 0x5fc   :  { %v687_v31 = vpop.f32.mrf.mxu1 }
 0x602   :  { %v765_v20 = vpop.f32.mrf.mxu0 }
 0x603   :  { %856 = vrot.lane.b32.xlu1 %v765_v20, %s3352_s21 }
 0x612   :  { %v739_v30 = vpop.f32.mrf.mxu3 }
 0x613   :  { %850 = vrot.lane.b32.xlu0 %v739_v30, %s3350_s30  ;;  %v1042_v30 = vld [vmem:[%s3339_s14 + $0x60] sm:$0xff] }
 0x614   :  { %1049 = vmatpush.msra.mxu2 %v1042_v30 }
 0x61f   :  { %v791_v36 = vpop.f32.mrf.mxu1 }
 0x620   :  { %858 = vrot.lane.b32.xlu1 %v791_v36, %s3352_s21 }
 0x62d   :  { %v817_v32 = vpop.f32.mrf.mxu2 }
 0x62e   :  { %864 = vrot.lane.b32.xlu2 %v817_v32, %s3356_s1 }
 0x638   :  { %v843_v37 = vpop.f32.mrf.mxu3 }
 0x639   :  { %866 = vrot.lane.b32.xlu2 %v843_v37, %s3356_s1 }
 0x64b   :  { %v849_v39 = vpop.permute.xlu2 %848 }
 0x64c   :  { %v870_v47 = vsel %vm343_vm10, %v661_v29, %v849_v39 }
 0x675   :  { %v857_v45 = vpop.permute.xlu1 %856 }
 0x676   :  { %v873_v48 = vsel %vm872_vm12, %v870_v47, %v857_v45  ;;  %v2299_v47 = vld [vmem:[%s3336_s11] ss:$0 sm:$0xff] }
 0x685   :  { %v851_v52 = vpop.permute.xlu0 %850 }
 0x686   :  { %v871_v53 = vsel %vm343_vm10, %v687_v31, %v851_v52 }
 0x688   :  { %v865_v50 = vpop.permute.xlu2 %864 }
 0x689   :  { %v876_v51 = vsel %vm875_vm13, %v873_v48, %v865_v50 }
 0x68a   :  { %2137 = vmatmul.msk.f32.vlgmr.msra.gmra.mxu0 %vm127_vm2, %v876_v51 }
 0x692   :  { %v859_v54 = vpop.permute.xlu1 %858 }
 0x693   :  { %v874_v55 = vsel %vm872_vm12, %v871_v53, %v859_v54  ;;  %v867_v57 = vpop.permute.xlu2 %866 }
 0x694   :  { %v877_v59 = vsel %vm875_vm13, %v874_v55, %v867_v57 }
 0x695   :  { %2138 = vmatmul.msk.f32.gmra.mxu0 %vm127_vm2, %v877_v59 }
 0x707   :  { %v905_v61 = vpop.f32.mrf.mxu0 }
 0x708   :  { %v911_v63 = vadd.f32 %v905_v61, %v2604_v24  ;;  %v1041_v61 = vld [vmem:[%s3339_s14 + $0x58] sm:$0xff] }
 0x709   :  { %1050 = vmatpush.msra.mxu2 %v1041_v61  ;;  %v2149_v61 = vld [vmem:[%s3329_s4 + $0x70] sm:$0xff] }
 0x70a   :  { %v2862_v62 = vadd.f32 %v2297_v60, %v911_v63  ;;  %v1040_v63 = vld [vmem:[%s3339_s14 + $0x50] sm:$0xff]  ;;  %1169 = vmatpush.msra.mxu1 %v2149_v61 }
 0x70b   :  { %1051 = vmatpush.msra.mxu2 %v1040_v63  ;;  %v2150_v63 = vld [vmem:[%s3329_s4 + $0x78] sm:$0xff] }
 0x70c   :  { %v921_v2 = vsel %vm127_vm2, %v2862_v62, 0.0  ;;  %1192 = vmatpush.msrb.mxu0 %v2150_v63 }
 0x70d   :  { %922 = vadd.xlane.f32.xlu0 %v921_v2  ;;  %v1039_v2 = vld [vmem:[%s3339_s14 + $0x48] sm:$0xff] }
 0x70e   :  { %1052 = vmatpush.msra.mxu2 %v1039_v2  ;;  %v2147_v2 = vld [vmem:[%s3329_s4 + $0x60] sm:$0xff] }
 0x70f   :  { %1170 = vmatpush.msra.mxu1 %v2147_v2 }
 0x712   :  { %v908_v3 = vpop.f32.mrf.mxu0 }
 0x713   :  { %v912_v58 = vadd.f32 %v908_v3, %v2606_v25  ;;  %v1038_v3 = vld [vmem:[%s3339_s14 + $0x40] sm:$0xff] }
 0x714   :  { %1053 = vmatpush.msra.mxu2 %v1038_v3  ;;  %v2148_v3 = vld [vmem:[%s3329_s4 + $0x68] sm:$0xff] }
 0x715   :  { %v2867_v4 = vadd.f32 %v2297_v60, %v912_v58  ;;  %v1037_v58 = vld [vmem:[%s3339_s14 + $0x38] sm:$0xff]  ;;  %1193 = vmatpush.msrb.mxu0 %v2148_v3 }
 0x716   :  { %1054 = vmatpush.msra.mxu2 %v1037_v58  ;;  %v2145_v58 = vld [vmem:[%s3329_s4 + $0x50] sm:$0xff] }
 0x717   :  { %v924_v5 = vsel %vm127_vm2, %v2867_v4, 0.0  ;;  %1171 = vmatpush.msra.mxu1 %v2145_v58 }
 0x718   :  { %925 = vadd.xlane.f32.xlu1 %v924_v5  ;;  %v1036_v5 = vld [vmem:[%s3339_s14 + $0x30] sm:$0xff] }
 0x719   :  { %1055 = vmatpush.msra.mxu2 %v1036_v5  ;;  %v2146_v5 = vld [vmem:[%s3329_s4 + $0x58] sm:$0xff] }
 0x71a   :  { %1194 = vmatpush.msrb.mxu0 %v2146_v5 }
 0x780   :  { %v923_v42 = vpop.xlane.xlu0 %922 }
 0x781   :  { %v927_v7 = vmul.f32 %v923_v42, %v2612_v34  ;;  %v1035_v42 = vld [vmem:[%s3339_s14 + $0x28] sm:$0xff] }
 0x782   :  { %1056 = vmatpush.msra.mxu2 %v1035_v42  ;;  %v2143_v42 = vld [vmem:[%s3329_s4 + $0x40] sm:$0xff] }
 0x783   :  { %v929_v24 = vsub.f32 %v2862_v62, %v927_v7  ;;  %v1034_v7 = vld [vmem:[%s3339_s14 + $0x20] sm:$0xff]  ;;  %1172 = vmatpush.msra.mxu1 %v2143_v42 }
 0x784   :  { %1057 = vmatpush.msra.mxu2 %v1034_v7  ;;  %v2144_v7 = vld [vmem:[%s3329_s4 + $0x48] sm:$0xff] }
 0x785   :  { %v931_v8 = vmul.f32 %v929_v24, %v929_v24  ;;  %1195 = vmatpush.msrb.mxu0 %v2144_v7 }
 0x787   :  { %v933_v6 = vsel %vm127_vm2, %v931_v8, 0.0  ;;  %v1032_v8 = vld [vmem:[%s3339_s14 + $0x10] sm:$0xff] }
 0x788   :  { %934 = vadd.xlane.f32.xlu2 %v933_v6  ;;  %v1031_v6 = vld [vmem:[%s3339_s14 + $0x8] sm:$0xff] }
 0x78b   :  { %v926_v9 = vpop.xlane.xlu1 %925 }
 0x78c   :  { %v928_v10 = vmul.f32 %v926_v9, %v2612_v34  ;;  %v1030_v9 = vld [vmem:[%s3339_s14] sm:$0xff] }
 0x78e   :  { %v930_v25 = vsub.f32 %v2867_v4, %v928_v10  ;;  %v2300_v10 = vld [vmem:[%s3371_s20] ss:$0 sm:$0xff] }
 0x790   :  { %v932_v11 = vmul.f32 %v930_v25, %v930_v25 }
 0x792   :  { %v936_v12 = vsel %vm127_vm2, %v932_v11, 0.0 }
 0x793   :  { %937 = vadd.xlane.f32.xlu0 %v936_v12 }
 0x7fb   :  { %v935_v18 = vpop.xlane.xlu2 %934 }
 0x7fc   :  { %v939_v15 = vmul.f32 %v935_v18, %v2612_v34 }
 0x7fe   :  { %v941_v22 = vadd.f32 1e-05, %v939_v15 }
 0x800   :  { %2348 = vrsqrt.f32 %v941_v22  ;;  %vm949_vm15 = vweird.f32 %v941_v22 }
 0x806   :  { %v2349_v28 = vpop.eup %2348  ;;  %v938_v19 = vpop.xlane.xlu0 %937 }
 0x807   :  { %v944_v20 = vmul.f32 %v2349_v28, %v941_v22  ;;  %v940_v29 = vmul.f32 %v938_v19, %v2612_v34  ;;  %vm950_vm14 = vweird.f32 %v2349_v28 }
 0x808   :  { %vm951_vm0 = vmor %vm949_vm15, %vm950_vm14  ;;  %vm2078_vm14 = vcmask 785408   ;;  %vm2075_vm15 = vcmask 523264  }
 0x809   :  { %v945_v31 = vmul.f32 %v2349_v28, %v944_v20  ;;  %v942_v36 = vadd.f32 1e-05, %v940_v29 }
 0x80b   :  { %v946_v32 = vmul.f32 0.5, %v945_v31  ;;  %2350 = vrsqrt.f32 %v942_v36  ;;  %vm959_vm3 = vweird.f32 %v942_v36 }
 0x80d   :  { %v947_v37 = vsub.f32 1.5, %v946_v32 }
 0x80f   :  { %v948_v38 = vmul.f32 %v2349_v28, %v947_v37 }
 0x811   :  { %v2351_v44 = vpop.eup %2350  ;;  %v952_v46 = vsel %vm951_vm0, %v2349_v28, %v948_v38  ;;  %v2301_v38 = vld [vmem:[%s3340_s15] ss:$0 sm:$0xff] }
 0x812   :  { %v963_v39 = vmul.f32 %v952_v46, %v929_v24  ;;  %v954_v45 = vmul.f32 %v2351_v44, %v942_v36  ;;  %vm960_vm1 = vweird.f32 %v2351_v44  ;;  %v1033_v24 = vld [vmem:[%s3339_s14 + $0x18] sm:$0xff] }
 0x813   :  { %vm961_vm4 = vmor %vm959_vm3, %vm960_vm1  ;;  %1058 = vmatpush.msra.mxu2 %v1033_v24 }
 0x814   :  { %v968_v48 = vmul.f32 %v2298_v40, %v963_v39  ;;  %v955_v50 = vmul.f32 %v2351_v44, %v954_v45 }
 0x815   :  { %1059 = vmatpush.msra.mxu2 %v1032_v8 }
 0x816   :  { %v956_v51 = vmul.f32 0.5, %v955_v50  ;;  %v973_v52 = vadd.f32 %v2299_v47, %v968_v48 }
 0x817   :  { %1060 = vmatpush.msra.mxu2 %v1031_v6 }
 0x818   :  { %v957_v53 = vsub.f32 1.5, %v956_v51  ;;  %2139 = vmatmul.msk.f32.vlgmr.msrb.gmra.mxu1 %vm127_vm2, %v973_v52 }
 0x819   :  { %1061 = vmatpush.msra.mxu2 %v1030_v9 }
 0x81a   :  { %v958_v54 = vmul.f32 %v2351_v44, %v957_v53 }
 0x81c   :  { %v962_v55 = vsel %vm961_vm4, %v2351_v44, %v958_v54 }
 0x81d   :  { %v964_v57 = vmul.f32 %v962_v55, %v930_v25 }
 0x81f   :  { %v969_v59 = vmul.f32 %v2298_v40, %v964_v57 }
 0x821   :  { %v974_v60 = vadd.f32 %v2299_v47, %v969_v59 }
 0x823   :  { %2140 = vmatmul.msk.f32.gmra.mxu1 %vm127_vm2, %v974_v60 }
 0x895   :  { %v1006_v25 = vpop.f32.mrf.mxu1 }
 0x896   :  { %v1007_v11 = vadd.f32 %v2300_v10, %v1006_v25 }
 0x898   :  { %v1014_v12 = vmul.f32 0.044715, %v1007_v11  ;;  %v1012_v28 = vmul.f32 0.5, %v1007_v11 }
 0x89a   :  { %v1016_v13 = vmul.f32 %v1014_v12, %v1007_v11 }
 0x89c   :  { %v1018_v56 = vmul.f32 %v1016_v13, %v1007_v11 }
 0x89e   :  { %v1020_v14 = vadd.f32 %v1018_v56, %v1007_v11 }
 0x8a0   :  { %v1009_v17 = vpop.f32.mrf.mxu1  ;;  %v1022_v18 = vmul.f32 0.7978846, %v1020_v14 }
 0x8a1   :  { %v1010_v15 = vadd.f32 %v2300_v10, %v1009_v17 }
 0x8a2   :  { %2352 = vtanh.f32 %v1022_v18  ;;  %v2302_v18 = vld [vmem:[%s3333_s8 + $0x1] ss:$0 sm:$0xff] }
 0x8a3   :  { %v1015_v22 = vmul.f32 0.044715, %v1010_v15  ;;  %v1013_v36 = vmul.f32 0.5, %v1010_v15 }
 0x8a5   :  { %v1017_v23 = vmul.f32 %v1015_v22, %v1010_v15 }
 0x8a7   :  { %v1019_v26 = vmul.f32 %v1017_v23, %v1010_v15 }
 0x8a8   :  { %v2353_v21 = vpop.eup %2352 }
 0x8a9   :  { %v1026_v19 = vadd.f32 1.0, %v2353_v21  ;;  %v1021_v20 = vadd.f32 %v1019_v26, %v1010_v15  ;;  %v2303_v21 = vld [vmem:[%s3334_s9 + $0x1] ss:$0 sm:$0xff] }
 0x8ab   :  { %v1028_v29 = vmul.f32 %v1026_v19, %v1012_v28  ;;  %v1023_v30 = vmul.f32 0.7978846, %v1021_v20 }
 0x8ad   :  { %1062 = vmatmul.f32.vlgmr.msra.gmra.mxu2 %v1028_v29  ;;  %2354 = vtanh.f32 %v1023_v30 }
 0x8b3   :  { %v2355_v31 = vpop.eup %2354 }
 0x8b4   :  { %v1027_v32 = vadd.f32 1.0, %v2355_v31 }
 0x8b6   :  { %v1029_v37 = vmul.f32 %v1027_v32, %v1013_v36 }
 0x8b8   :  { %1065 = vmatmul.f32.gmra.mxu2 %v1029_v37 }
 0x930   :  { %v1063_v40 = vpop.f32.mrf.mxu2 }
 0x931   :  { %v1069_v44 = vadd.f32 %v1063_v40, %v2862_v62  ;;  %v2151_v40 = vld [vmem:[%s3330_s5 + $0x2] sm:$0x3]  ;;  %s3372_s5 = smov 104  }
 0x933   :  { %v2954_v46 = vadd.f32 %v2301_v38, %v1069_v44  ;;  %v1148_v44 = vperm.slane %v2151_v40, 1 }
 0x935   :  { %v1081_v39 = vsel %vm127_vm2, %v2954_v46, 0.0 }
 0x936   :  { %1082 = vadd.xlane.f32.xlu1 %v1081_v39 }
 0x93b   :  { %v1066_v45 = vpop.f32.mrf.mxu2 }
 0x93c   :  { %v1070_v47 = vadd.f32 %v1066_v45, %v2867_v4 }
 0x93e   :  { %v2959_v48 = vadd.f32 %v2301_v38, %v1070_v47 }
 0x940   :  { %v1084_v50 = vsel %vm127_vm2, %v2959_v48, 0.0 }
 0x941   :  { %1085 = vadd.xlane.f32.xlu2 %v1084_v50  ;;  %v2400_v50 = vld [vmem:[%s3370_s29] sm:$0xff] }
 0x9a9   :  { %v1083_v51 = vpop.xlane.xlu1 %1082 }
 0x9aa   :  { %v1087_v52 = vmul.f32 %v1083_v51, %v2612_v34 }
 0x9ac   :  { %v1089_v62 = vsub.f32 %v2954_v46, %v1087_v52  ;;  %v1147_v52 = vperm.slane %v2151_v40, 0 }
 0x9ae   :  { %v1091_v53 = vmul.f32 %v1089_v62, %v1089_v62 }
 0x9b0   :  { %v1093_v54 = vsel %vm127_vm2, %v1091_v53, 0.0 }
 0x9b1   :  { %1094 = vadd.xlane.f32.xlu0 %v1093_v54 }
 0x9b4   :  { %v1086_v55 = vpop.xlane.xlu2 %1085 }
 0x9b5   :  { %v1088_v57 = vmul.f32 %v1086_v55, %v2612_v34 }
 0x9b7   :  { %v1090_v4 = vsub.f32 %v2959_v48, %v1088_v57  ;;  %v2401_v57 = vld [vmem:[%s3370_s29 + $0x8] sm:$0xff]  ;;  %s3373_s29 = smov 96  }
 0x9b9   :  { %v1092_v59 = vmul.f32 %v1090_v4, %v1090_v4 }
 0x9bb   :  { %v1096_v60 = vsel %vm127_vm2, %v1092_v59, 0.0 }
 0x9bc   :  { %1097 = vadd.xlane.f32.xlu1 %v1096_v60 }
 0xa24   :  { %v1095_v24 = vpop.xlane.xlu0 %1094 }
 0xa25   :  { %v1099_v8 = vmul.f32 %v1095_v24, %v2612_v34  ;;  %v2403_v24 = vld [vmem:[%s3369_s24] sm:$0xff] }
 0xa27   :  { %v1101_v6 = vadd.f32 1e-05, %v1099_v8 }
 0xa29   :  { %2356 = vrsqrt.f32 %v1101_v6  ;;  %vm1109_vm6 = vweird.f32 %v1101_v6 }
 0xa2f   :  { %v2357_v9 = vpop.eup %2356  ;;  %v1098_v10 = vpop.xlane.xlu1 %1097 }
 0xa30   :  { %v1104_v25 = vmul.f32 %v2357_v9, %v1101_v6  ;;  %v1100_v11 = vmul.f32 %v1098_v10, %v2612_v34  ;;  %vm1110_vm5 = vweird.f32 %v2357_v9 }
 0xa31   :  { %vm1111_vm7 = vmor %vm1109_vm6, %vm1110_vm5 }
 0xa32   :  { %v1105_v12 = vmul.f32 %v2357_v9, %v1104_v25  ;;  %v1102_v13 = vadd.f32 1e-05, %v1100_v11 }
 0xa34   :  { %v1106_v56 = vmul.f32 0.5, %v1105_v12  ;;  %2358 = vrsqrt.f32 %v1102_v13  ;;  %vm1119_vm9 = vweird.f32 %v1102_v13 }
 0xa36   :  { %v1107_v14 = vsub.f32 1.5, %v1106_v56 }
 0xa38   :  { %v1108_v17 = vmul.f32 %v2357_v9, %v1107_v14 }
 0xa3a   :  { %v2359_v15 = vpop.eup %2358  ;;  %v1112_v22 = vsel %vm1111_vm7, %v2357_v9, %v1108_v17 }
 0xa3b   :  { %v1123_v23 = vmul.f32 %v1112_v22, %v1089_v62  ;;  %v1114_v26 = vmul.f32 %v2359_v15, %v1102_v13  ;;  %vm1120_vm8 = vweird.f32 %v2359_v15 }
 0xa3c   :  { %vm1121_vm11 = vmor %vm1119_vm9, %vm1120_vm8 }
 0xa3d   :  { %v1128_v28 = vmul.f32 %v2302_v18, %v1123_v23  ;;  %v1115_v19 = vmul.f32 %v2359_v15, %v1114_v26 }
 0xa3f   :  { %v1116_v20 = vmul.f32 0.5, %v1115_v19  ;;  %v1133_v29 = vadd.f32 %v2303_v21, %v1128_v28 }
 0xa41   :  { %v1117_v30 = vsub.f32 1.5, %v1116_v20  ;;  %2152 = vmatmul.msk.f32.vlgmr.msra.gmra.mxu1 %vm127_vm2, %v1133_v29  ;;  %2154 = vmatmul.msk.f32.vlgmr.msrb.gmra.mxu0 %vm127_vm2, %v1133_v29 }
 0xa43   :  { %v1118_v31 = vmul.f32 %v2359_v15, %v1117_v30 }
 0xa45   :  { %v1122_v36 = vsel %vm1121_vm11, %v2359_v15, %v1118_v31 }
 0xa46   :  { %v1124_v32 = vmul.f32 %v1122_v36, %v1090_v4 }
 0xa48   :  { %v1129_v37 = vmul.f32 %v2302_v18, %v1124_v32 }
 0xa4a   :  { %v1134_v38 = vadd.f32 %v2303_v21, %v1129_v37 }
 0xa4c   :  { %2153 = vmatmul.msk.f32.gmra.mxu1 %vm127_vm2, %v1134_v38  ;;  %2155 = vmatmul.msk.f32.gmra.mxu0 %vm127_vm2, %v1134_v38 }
 0xabe   :  { %v1197_v39 = vpop.f32.mrf.mxu0  ;;  %v1174_v47 = vpop.f32.mrf.mxu1 }
 0xabf   :  { %v1198_v45 = vadd.f32 %v1197_v39, %v1148_v44  ;;  %v3021_v60 = vadd.f32 %v1174_v47, %v1147_v52 }
 0xac1   :  { %v1219_v51 = vmul.f32 %v2400_v50, %v1198_v45  ;;  %v1205_v61 = vmul.f32 %v3021_v60, %v2687_v35  ;;  %v1203_v8 = vmul.f32 %v2403_v24, %v3021_v60 }
 0xac3   :  { %1223 = vrot.lane.b32.xlu0 %v1219_v51, %s2433_s25 }
 0xac9   :  { %v1177_v62 = vpop.f32.mrf.mxu1  ;;  %v1200_v53 = vpop.f32.mrf.mxu0 }
 0xaca   :  { %v3012_v54 = vadd.f32 %v1177_v62, %v1147_v52  ;;  %v1201_v55 = vadd.f32 %v1200_v53, %v1148_v44 }
 0xacc   :  { %v1220_v4 = vmul.f32 %v2401_v57, %v1201_v55  ;;  %v1206_v59 = vmul.f32 %v3012_v54, %v2709_v49  ;;  %v1218_v63 = vmul.f32 %v3012_v54, %v2701_v43  ;;  %v1217_v49 = vmul.f32 %v3021_v60, %v2697_v41  ;;  %v2402_v41 = vld [vmem:[%s3369_s24 + $0x8] sm:$0xff]  ;;  %s3374_s24 = smov 64  }
 0xacd   :  { %v1204_v43 = vmul.f32 %v2402_v41, %v3012_v54  ;;  %v2275_v14 = vpack.i.bf16 %v3012_v54, %v3021_v60 }
 0xace   :  { %1225 = vrot.lane.b32.xlu2 %v1220_v4, %s2433_s25  ;;  %1211 = vrot.lane.b32.xlu0 %v1206_v59, %s2433_s25 }
 0xad6   :  { %1209 = vrot.lane.b32.xlu0 %v1205_v61, %s2433_s25 }
 0xb28   :  { %v1226_v2 = vpop.permute.xlu2 %1225 }
 0xb29   :  { %v3028_v3 = vadd.f32 %v1226_v2, %v1218_v63 }
 0xb2b   :  { %1249 = vrot.lane.b32.xlu1 %v3028_v3, %s2436_s26  ;;  %1253 = vrot.lane.b32.xlu0 %v3028_v3, %s2435_s3 }
 0xb35   :  { %v1224_v58 = vpop.permute.xlu0 %1223 }
 0xb36   :  { %v3036_v5 = vadd.f32 %v1224_v58, %v1217_v49 }
 0xb38   :  { %1247 = vrot.lane.b32.xlu2 %v3036_v5, %s2436_s26  ;;  %1255 = vrot.lane.b32.xlu1 %v3036_v5, %s3372_s5 }
 0xb39   :  { %1273 = vrot.lane.b32.xlu0 %v3036_v5, %s3373_s29 }
 0xb40   :  { %1251 = vrot.lane.b32.xlu2 %v3036_v5, %s2435_s3  ;;  %1257 = vrot.lane.b32.xlu1 %v3028_v3, %s3372_s5  ;;  %v1212_v35 = vpop.permute.xlu0 %1211 }
 0xb41   :  { %v1216_v42 = vadd.f32 %v1212_v35, %v1204_v43 }
 0xb48   :  { %1299 = vrot.lane.b32.xlu2 %v3028_v3, %s3373_s29  ;;  %v1210_v7 = vpop.permute.xlu0 %1209 }
 0xb49   :  { %v1215_v6 = vadd.f32 %v1210_v7, %v1203_v8 }
 0xb50   :  { %1235 = vrot.lane.b32.xlu2 %v1216_v42, %s2436_s26 }
 0xb58   :  { %1233 = vrot.lane.b32.xlu2 %v1215_v6, %s2436_s26 }
 0xb92   :  { %v1248_v9 = vpop.permute.xlu2 %1247 }
 0xb93   :  { %1325 = vrot.lane.b32.xlu0 %v1248_v9, %s3373_s29 }
 0xb9a   :  { %v1252_v10 = vpop.permute.xlu2 %1251 }
 0xb9b   :  { %1241 = vrot.lane.b32.xlu0 %v1215_v6, %s3372_s5 }
 0xb9d   :  { %v1250_v25 = vpop.permute.xlu1 %1249  ;;  %v1254_v11 = vpop.permute.xlu0 %1253 }
 0xb9e   :  { %1351 = vrot.lane.b32.xlu1 %v1250_v25, %s3373_s29  ;;  %1403 = vrot.lane.b32.xlu2 %v1254_v11, %s3373_s29 }
 0xba2   :  { %v1300_v12 = vpop.permute.xlu2 %1299 }
 0xba3   :  { %2158 = vmatpush.xpose.msk.msrb.mxu3 %vm343_vm10, %v1300_v12  ;;  %1237 = vrot.lane.b32.xlu0 %v1215_v6, %s2435_s3 }
 0xba6   :  { %2159 = vmatmul.msk.f32.vlgmr.msrb.gmra.mxu3 %vm343_vm10, %v1216_v42 }
 0xbaa   :  { %v1256_v13 = vpop.permute.xlu1 %1255  ;;  %v1236_v18 = vpop.permute.xlu2 %1235 }
 0xbab   :  { %v1274_v56 = vpop.permute.xlu0 %1273  ;;  %1429 = vrot.lane.b32.xlu1 %v1256_v13, %s3373_s29  ;;  %1243 = vrot.lane.b32.xlu0 %v1216_v42, %s3372_s5 }
 0xbac   :  { %2156 = vmatpush.xpose.msk.msrb.mxu1 %vm343_vm10, %v1274_v56 }
 0xbaf   :  { %2157 = vmatmul.msk.f32.vlgmr.msrb.gmra.mxu1 %vm343_vm10, %v1215_v6 }
 0xbb2   :  { %v1258_v17 = vpop.permute.xlu1 %1257  ;;  %v1234_v15 = vpop.permute.xlu2 %1233 }
 0xbb3   :  { %1377 = vrot.lane.b32.xlu1 %v1252_v10, %s3373_s29  ;;  %2276 = vrot.lane.b32.xlu0 %v2275_v14, %s2435_s3 }
 0xbb4   :  { %1455 = vrot.lane.b32.xlu2 %v1258_v17, %s3373_s29 }
 0xbbb   :  { %1239 = vrot.lane.b32.xlu1 %v1216_v42, %s2435_s3  ;;  %s3375_s3 = smov 8  }
 0xbbc   :  { %2266 = vrot.lane.b32.xlu2 %v2275_v14, %s2436_s26  ;;  %s3376_s26 = smov 16  }
 0xbc3   :  { %2271 = vrot.lane.b32.xlu1 %v2275_v14, %s3372_s5 }
 0xbf8   :  { %v1404_v23 = vpop.permute.xlu2 %1403 }
 0xc05   :  { %v1326_v22 = vpop.permute.xlu0 %1325 }
 0xc06   :  { %2160 = vmatpush.xpose.msk.msra.mxu1 %vm343_vm10, %v1326_v22 }
 0xc09   :  { %2161 = vmatmul.msk.f32.vlgmr.msra.gmra.mxu1 %vm343_vm10, %v1234_v15 }
 0xc0a   :  { %2166 = vmatpush.xpose.msk.msrb.mxu1 %vm343_vm10, %v1404_v23 }
 0xc0d   :  { %v1242_v21 = vpop.permute.xlu0 %1241 }
 0xc0e   :  { %v1456_v20 = vpop.permute.xlu2 %1455 }
 0xc10   :  { %v1352_v26 = vpop.permute.xlu1 %1351 }
 0xc11   :  { %2162 = vmatpush.xpose.msk.msra.mxu3 %vm343_vm10, %v1352_v26 }
 0xc14   :  { %2163 = vmatmul.msk.f32.vlgmr.msra.gmra.mxu3 %vm343_vm10, %v1236_v18 }
 0xc15   :  { %v1238_v29 = vpop.permute.xlu0 %1237 }
 0xc16   :  { %v2267_v50 = vpop.permute.xlu2 %2266 }
 0xc17   :  { %v2268_v25 = vunpack.i.l.bf16 %v2267_v50 }
 0xc19   :  { %v2280_v13 = vpack.i.bf16 %v3021_v60, %v2268_v25 }
 0xc1d   :  { %v1430_v28 = vpop.permute.xlu1 %1429  ;;  %v1244_v44 = vpop.permute.xlu0 %1243 }
 0xc1e   :  { %2168 = vmatpush.xpose.msk.msrb.mxu3 %vm343_vm10, %v1430_v28 }
 0xc21   :  { %2169 = vmatmul.msk.f32.vlgmr.msrb.gmra.mxu3 %vm343_vm10, %v1242_v21  ;;  %v2269_v21 = vunpack.i.h.bf16 %v2267_v50 }
 0xc25   :  { %v1378_v19 = vpop.permute.xlu1 %1377  ;;  %v3097_v51 = vpop.permute.xlu0 %2276 }
 0xc26   :  { %2164 = vmatpush.xpose.msk.msra.mxu0 %vm343_vm10, %v1378_v19  ;;  %v2278_v23 = vunpack.i.l.bf16 %v3097_v51 }
 0xc28   :  { %v2290_v19 = vpack.i.bf16 %v2269_v21, %v2278_v23 }
 0xc29   :  { %v1322_v30 = vpop.f32.mrf.mxu3  ;;  %2165 = vmatmul.msk.f32.vlgmr.msra.gmra.mxu0 %vm343_vm10, %v1238_v29 }
 0xc2a   :  { %2170 = vmatpush.xpose.msk.msrb.mxu0 %vm343_vm10, %v1456_v20  ;;  %v1323_v31 = vadd.f32 %v1322_v30, %v2763_v16 }
 0xc2c   :  { %v1296_v36 = vpop.f32.mrf.mxu1  ;;  %v1484_v32 = vsel %vm343_vm10, %v1323_v31, -inf }
 0xc2d   :  { %v1297_v37 = vadd.f32 %v1296_v36, %v2763_v16  ;;  %v1240_v38 = vpop.permute.xlu1 %1239  ;;  %1485 = vmax.xlane.f32.xlu0 %v1484_v32 }
 0xc2e   :  { %2167 = vmatmul.msk.f32.vlgmr.msrb.gmra.mxu1 %vm343_vm10, %v1240_v38 }
 0xc2f   :  { %v1481_v40 = vsel %vm343_vm10, %v1297_v37, -inf }
 0xc30   :  { %1482 = vmax.xlane.f32.xlu2 %v1481_v40 }
 0xc31   :  { %2171 = vmatmul.msk.f32.vlgmr.msrb.gmra.mxu0 %vm343_vm10, %v1244_v44 }
 0xc35   :  { %v3119_v56 = vpop.permute.xlu1 %2271 }
 0xc86   :  { %v1348_v39 = vpop.f32.mrf.mxu1 }
 0xc87   :  { %v1349_v45 = vadd.f32 %v1348_v39, %v2763_v16 }
 0xc89   :  { %v1487_v47 = vsel %vm343_vm10, %v1349_v45, -inf }
 0xc8a   :  { %1488 = vmax.xlane.f32.xlu1 %v1487_v47 }
 0xc97   :  { %v1374_v62 = vpop.f32.mrf.mxu3 }
 0xc98   :  { %v1375_v8 = vadd.f32 %v1374_v62, %v2763_v16 }
 0xc9a   :  { %v1490_v9 = vsel %vm343_vm10, %v1375_v8, -inf }
 0xca0   :  { %v1486_v61 = vpop.xlane.xlu0 %1485 }
 0xca1   :  { %v1506_v41 = vsub.f32 %v1323_v31, %v1486_v61 }
 0xca3   :  { %v1483_v57 = vpop.xlane.xlu2 %1482  ;;  %v1515_v24 = vmul.f32 1.442695, %v1506_v41 }
 0xca4   :  { %v1505_v63 = vsub.f32 %v1297_v37, %v1483_v57  ;;  %v1452_v58 = vpop.f32.mrf.mxu3 }
 0xca5   :  { %v3106_v7 = vadd.f32 %v1452_v58, %v2763_v16 }
 0xca6   :  { %v1400_v52 = vpop.f32.mrf.mxu0  ;;  %v1513_v43 = vmul.f32 1.442695, %v1505_v63 }
 0xca7   :  { %v1401_v53 = vadd.f32 %v1400_v52, %v2763_v16  ;;  %v1499_v6 = vsel %vm343_vm10, %v3106_v7, -inf }
 0xca8   :  { %2360 = vpow2.f32 %v1513_v43  ;;  %v2273_v43 = vunpack.i.l.bf16 %v3119_v56 }
 0xca9   :  { %v1493_v55 = vsel %vm343_vm10, %v1401_v53, -inf  ;;  %2362 = vpow2.f32 %v1515_v24 }
 0xcaa   :  { %1494 = vmax.xlane.f32.xlu2 %v1493_v55  ;;  %v2285_v24 = vpack.i.bf16 %v2273_v43, %v3012_v54 }
 0xcab   :  { %v1426_v4 = vpop.f32.mrf.mxu1 }
 0xcac   :  { %v1427_v59 = vadd.f32 %v1426_v4, %v2763_v16 }
 0xcae   :  { %v1478_v2 = vpop.f32.mrf.mxu0  ;;  %v1496_v49 = vsel %vm343_vm10, %v1427_v59, -inf  ;;  %v2361_v10 = vpop.eup %2360 }
 0xcaf   :  { %v1479_v35 = vadd.f32 %v1478_v2, %v2763_v16  ;;  %1497 = vmax.xlane.f32.xlu1 %v1496_v49  ;;  %v3112_v11 = vpop.eup %2362  ;;  %v1529_v12 = vsel %vm343_vm10, %v2361_v10, 0.0 }
 0xcb0   :  { %v1532_v16 = vsel %vm343_vm10, %v3112_v11, 0.0 }
 0xcb1   :  { %v1502_v42 = vsel %vm343_vm10, %v1479_v35, -inf }
 0xcb2   :  { %1503 = vmax.xlane.f32.xlu0 %v1502_v42 }
 0xcb7   :  { %1500 = vmax.xlane.f32.xlu1 %v1499_v6 }
 0xcba   :  { %1491 = vmax.xlane.f32.xlu0 %v1490_v9 }
 0xcbf   :  { %1530 = vadd.xlane.f32.xlu1 %v1529_v12 }
 0xcc2   :  { %2281 = vrot.lane.b32.xlu2 %v2280_v13, %s3374_s24  ;;  %1533 = vadd.xlane.f32.xlu0 %v1532_v16 }
 0xcfd   :  { %v1489_v14 = vpop.xlane.xlu1 %1488 }
 0xcfe   :  { %v1507_v17 = vsub.f32 %v1349_v45, %v1489_v14 }
 0xd00   :  { %v1517_v18 = vmul.f32 1.442695, %v1507_v17 }
 0xd02   :  { %2364 = vpow2.f32 %v1517_v18 }
 0xd08   :  { %v2365_v15 = vpop.eup %2364 }
 0xd09   :  { %v1535_v22 = vsel %vm343_vm10, %v2365_v15, 0.0 }
 0xd0a   :  { %1536 = vadd.xlane.f32.xlu2 %v1535_v22 }
 0xd1d   :  { %v1495_v26 = vpop.xlane.xlu2 %1494 }
 0xd1e   :  { %v1509_v28 = vsub.f32 %v1401_v53, %v1495_v26 }
 0xd20   :  { %v1521_v20 = vmul.f32 1.442695, %v1509_v28 }
 0xd22   :  { %2366 = vpow2.f32 %v1521_v20  ;;  %v1498_v29 = vpop.xlane.xlu1 %1497  ;;  %2291 = vrot.lane.b32.xlu2 %v2290_v19, %s3374_s24 }
 0xd23   :  { %v1510_v30 = vsub.f32 %v1427_v59, %v1498_v29 }
 0xd25   :  { %v1523_v31 = vmul.f32 1.442695, %v1510_v30  ;;  %v2282_v36 = vpop.permute.xlu2 %2281  ;;  %v1504_v32 = vpop.xlane.xlu0 %1503 }
 0xd26   :  { %v2284_v37 = vunpack.i.h.bf16 %v2282_v36  ;;  %v2283_v38 = vunpack.i.l.bf16 %v2282_v36  ;;  %v1512_v44 = vsub.f32 %v1479_v35, %v1504_v32 }
 0xd27   :  { %2368 = vpow2.f32 %v1523_v31 }
 0xd28   :  { %v2367_v40 = vpop.eup %2366  ;;  %1590 = vmatpush.msra.mxu1 %v2284_v37  ;;  %1642 = vmatpush.msra.mxu3 %v2283_v38  ;;  %v1527_v47 = vmul.f32 1.442695, %v1512_v44 }
 0xd29   :  { %v1541_v39 = vsel %vm343_vm10, %v2367_v40, 0.0 }
 0xd2a   :  { %1542 = vadd.xlane.f32.xlu1 %v1541_v39  ;;  %v1501_v45 = vpop.xlane.xlu1 %1500  ;;  %2370 = vpow2.f32 %v1527_v47 }
 0xd2b   :  { %v1511_v63 = vsub.f32 %v3106_v7, %v1501_v45  ;;  %v2279_v7 = vunpack.i.h.bf16 %v3097_v51 }
 0xd2d   :  { %v1492_v50 = vpop.xlane.xlu0 %1491  ;;  %v3125_v52 = vpop.eup %2368  ;;  %v1525_v35 = vmul.f32 1.442695, %v1511_v63 }
 0xd2e   :  { %v1508_v62 = vsub.f32 %v1375_v8, %v1492_v50  ;;  %v1544_v55 = vsel %vm343_vm10, %v3125_v52, 0.0  ;;  %v2274_v8 = vunpack.i.h.bf16 %v3119_v56 }
 0xd30   :  { %v1519_v53 = vmul.f32 1.442695, %v1508_v62  ;;  %v2371_v4 = vpop.eup %2370 }
 0xd31   :  { %v1550_v2 = vsel %vm343_vm10, %v2371_v4, 0.0 }
 0xd32   :  { %2372 = vpow2.f32 %v1519_v53  ;;  %1545 = vadd.xlane.f32.xlu1 %v1544_v55  ;;  %v1531_v57 = vpop.xlane.xlu1 %1530  ;;  %v2183_v55 = vld [vmem:[%s3331_s6 + $0x38] sm:$0xff] }
 0xd33   :  { %2374 = vrcp.f32 %v1531_v57  ;;  %v2182_v57 = vld [vmem:[%s3331_s6 + $0x30] sm:$0xff] }
 0xd34   :  { %2376 = vpow2.f32 %v1525_v35 }
 0xd35   :  { %v1534_v14 = vpop.xlane.xlu0 %1533 }
 0xd38   :  { %v2373_v59 = vpop.eup %2372 }
 0xd39   :  { %v2375_v61 = vpop.eup %2374  ;;  %v1538_v49 = vsel %vm343_vm10, %v2373_v59, 0.0 }
 0xd3a   :  { %v1561_v58 = vmul.f32 %v2375_v61, %v2361_v10  ;;  %1551 = vadd.xlane.f32.xlu1 %v1550_v2  ;;  %1539 = vadd.xlane.f32.xlu0 %v1538_v49  ;;  %v2377_v41 = vpop.eup %2376 }
 0xd3b   :  { %v1547_v42 = vsel %vm343_vm10, %v2377_v41, 0.0 }
 0xd3c   :  { %2172 = vmatmul.msk.f32.vlgmr.msra.gmra.mxu1 %vm343_vm10, %v1561_v58 }
 0xd4b   :  { %1548 = vadd.xlane.f32.xlu2 %v1547_v42 }
 0xd4e   :  { %2286 = vrot.lane.b32.xlu0 %v2285_v24, %s3374_s24 }
 0xd53   :  { %1699 = vrot.lane.b32.xlu1 %v2279_v7, %s3374_s24 }
 0xd63   :  { %1751 = vrot.lane.b32.xlu2 %v2274_v8, %s3374_s24 }
 0xd7d   :  { %v1537_v6 = vpop.xlane.xlu2 %1536 }
 0xd7e   :  { %2378 = vrcp.f32 %v1537_v6  ;;  %v2304_v6 = vld [vmem:[%s3332_s7 + $0x1] ss:$0 sm:$0xff] }
 0xd84   :  { %v2379_v9 = vpop.eup %2378 }
 0xd85   :  { %v1563_v10 = vmul.f32 %v2379_v9, %v2365_v15  ;;  %v2292_v25 = vpop.permute.xlu2 %2291 }
 0xd86   :  { %v2294_v12 = vunpack.i.h.bf16 %v2292_v25  ;;  %v2293_v13 = vunpack.i.l.bf16 %v2292_v25 }
 0xd87   :  { %2174 = vmatmul.msk.f32.vlgmr.msra.gmra.mxu3 %vm343_vm10, %v1563_v10 }
 0xd88   :  { %1668 = vmatpush.msra.mxu0 %v2294_v12  ;;  %1694 = vmatpush.msrb.mxu1 %v2293_v13 }
 0xd8a   :  { %1830 = vmatpush.msra.mxu1 %v2183_v55 }
 0xd8c   :  { %1831 = vmatpush.msra.mxu1 %v2182_v57  ;;  %v2306_v57 = vld [vmem:[%s3336_s11 + $0x1] ss:$0 sm:$0xff] }
 0xd9d   :  { %v1543_v16 = vpop.xlane.xlu1 %1542 }
 0xd9e   :  { %2380 = vrcp.f32 %v1543_v16 }
 0xda4   :  { %v2381_v51 = vpop.eup %2380 }
 0xda5   :  { %v1565_v17 = vmul.f32 %v2381_v51, %v2367_v40  ;;  %v1546_v18 = vpop.xlane.xlu1 %1545 }
 0xda7   :  { %2176 = vmatmul.msk.f32.vlgmr.msrb.gmra.mxu1 %vm343_vm10, %v1565_v17 }
 0xdad   :  { %v1540_v56 = vpop.xlane.xlu0 %1539  ;;  %v1552_v15 = vpop.xlane.xlu1 %1551 }
 0xdae   :  { %2382 = vrcp.f32 %v1540_v56 }
 0xdaf   :  { %2384 = vrcp.f32 %v1534_v14 }
 0xdb0   :  { %2386 = vrcp.f32 %v1552_v15  ;;  %v2192_v15 = vld [vmem:[%s3337_s12 + $0x38] sm:$0xff] }
 0xdb4   :  { %v2383_v22 = vpop.eup %2382 }
 0xdb5   :  { %v1564_v23 = vmul.f32 %v2383_v22, %v2373_v59  ;;  %v2385_v21 = vpop.eup %2384  ;;  %v2180_v59 = vld [vmem:[%s3331_s6 + $0x20] sm:$0xff] }
 0xdb6   :  { %v1562_v29 = vmul.f32 %v2385_v21, %v3112_v11  ;;  %v2387_v30 = vpop.eup %2386 }
 0xdb7   :  { %2175 = vmatmul.msk.f32.vlgmr.msra.gmra.mxu0 %vm343_vm10, %v1564_v23  ;;  %v1568_v32 = vmul.f32 %v2387_v30, %v2371_v4  ;;  %v2181_v4 = vld [vmem:[%s3331_s6 + $0x28] sm:$0xff] }
 0xdb8   :  { %1832 = vmatpush.msra.mxu1 %v2181_v4  ;;  %v2209_v30 = vld [vmem:[%s3339_s14 + $0xe8] sm:$0xff] }
 0xdb9   :  { %v1592_v39 = vpop.f32.mrf.mxu1 }
 0xdba   :  { %1833 = vmatpush.msra.mxu1 %v2180_v59 }
 0xdbe   :  { %v1549_v26 = vpop.xlane.xlu2 %1548 }
 0xdbf   :  { %2388 = vrcp.f32 %v1549_v26  ;;  %v2191_v26 = vld [vmem:[%s3337_s12 + $0x30] sm:$0xff] }
 0xdc0   :  { %v2287_v28 = vpop.permute.xlu0 %2286  ;;  %2390 = vrcp.f32 %v1546_v18 }
 0xdc1   :  { %v2289_v19 = vunpack.i.h.bf16 %v2287_v28  ;;  %v2288_v20 = vunpack.i.l.bf16 %v2287_v28 }
 0xdc3   :  { %1616 = vmatpush.msrb.mxu2 %v2288_v20  ;;  %1746 = vmatpush.msrb.mxu3 %v2289_v19  ;;  %v2211_v20 = vld [vmem:[%s3339_s14 + $0xf8] sm:$0xff] }
 0xdc4   :  { %2173 = vmatmul.msk.f32.vlgmr.msrb.gmra.mxu2 %vm343_vm10, %v1562_v29  ;;  %v2210_v29 = vld [vmem:[%s3339_s14 + $0xf0] sm:$0xff] }
 0xdc5   :  { %v2389_v31 = vpop.eup %2388  ;;  %v1700_v36 = vpop.permute.xlu1 %1699  ;;  %1982 = vmatpush.msra.mxu3 %v2211_v20 }
 0xdc6   :  { %v1567_v37 = vmul.f32 %v2389_v31, %v2377_v41  ;;  %v1752_v38 = vpop.permute.xlu2 %1751  ;;  %1720 = vmatpush.msra.mxu2 %v1700_v36  ;;  %v2391_v40 = vpop.eup %2390 }
 0xdc7   :  { %1772 = vmatpush.msrb.mxu0 %v1752_v38  ;;  %v1566_v44 = vmul.f32 %v2391_v40, %v3125_v52  ;;  %1983 = vmatpush.msra.mxu3 %v2210_v29 }
 0xdc8   :  { %2178 = vmatmul.msk.f32.vlgmr.msrb.gmra.mxu3 %vm343_vm10, %v1567_v37  ;;  %2179 = vmatmul.msk.f32.vlgmr.msrb.gmra.mxu0 %vm343_vm10, %v1568_v32  ;;  %v2208_v32 = vld [vmem:[%s3339_s14 + $0xe0] sm:$0xff] }
 0xdc9   :  { %1936 = vmatpush.msrb.mxu2 %v2192_v15  ;;  %1984 = vmatpush.msra.mxu3 %v2209_v30 }
 0xdcb   :  { %1937 = vmatpush.msrb.mxu2 %v2191_v26  ;;  %1985 = vmatpush.msra.mxu3 %v2208_v32  ;;  %v2017_v26 = vld [vmem:[%s3341_s16 + $0x18] sm:$0xff] }
 0xdcc   :  { %2177 = vmatmul.msk.f32.vlgmr.msra.gmra.mxu2 %vm343_vm10, %v1566_v44  ;;  %2040 = vmatpush.msra.mxu0 %v2017_v26 }
 0xe0a   :  { %v1644_v11 = vpop.f32.mrf.mxu3 }
 0xe0b   :  { %1779 = vrot.lane.b32.xlu0 %v1644_v11, %s3375_s3 }
 0xe24   :  { %v1696_v45 = vpop.f32.mrf.mxu1 }
 0xe25   :  { %1787 = vrot.lane.b32.xlu2 %v1696_v45, %s3376_s26 }
 0xe34   :  { %v1670_v47 = vpop.f32.mrf.mxu0 }
 0xe35   :  { %1781 = vrot.lane.b32.xlu2 %v1670_v47, %s3375_s3 }
 0xe45   :  { %v1774_v50 = vpop.f32.mrf.mxu0 }
 0xe46   :  { %1797 = vrot.lane.b32.xlu1 %v1774_v50, %s3377_s27 }
 0xe47   :  { %v1618_v62 = vpop.f32.mrf.mxu2 }
 0xe4b   :  { %v1748_v53 = vpop.f32.mrf.mxu3 }
 0xe4c   :  { %1795 = vrot.lane.b32.xlu0 %v1748_v53, %s3377_s27 }
 0xe4f   :  { %v1722_v52 = vpop.f32.mrf.mxu2 }
 0xe54   :  { %1789 = vrot.lane.b32.xlu0 %v1722_v52, %s3376_s26 }
 0xe7d   :  { %v1780_v61 = vpop.permute.xlu0 %1779 }
 0xe7e   :  { %v1801_v63 = vsel %vm343_vm10, %v1592_v39, %v1780_v61 }
 0xe7f   :  { %v1788_v2 = vpop.permute.xlu2 %1787 }
 0xe80   :  { %v1803_v49 = vsel %vm872_vm12, %v1801_v63, %v1788_v2 }
 0xe8f   :  { %v1782_v41 = vpop.permute.xlu2 %1781 }
 0xe90   :  { %v1802_v43 = vsel %vm343_vm10, %v1618_v62, %v1782_v41 }
 0xeb8   :  { %v1798_v24 = vpop.permute.xlu1 %1797 }
 0xebe   :  { %v1796_v58 = vpop.permute.xlu0 %1795 }
 0xebf   :  { %v1805_v35 = vsel %vm875_vm13, %v1803_v49, %v1796_v58 }
 0xec0   :  { %2184 = vmatmul.msk.f32.vlgmr.msra.gmra.mxu1 %vm127_vm2, %v1805_v35 }
 0xec6   :  { %v1790_v42 = vpop.permute.xlu0 %1789 }
 0xec7   :  { %v1804_v7 = vsel %vm872_vm12, %v1802_v43, %v1790_v42 }
 0xec8   :  { %v1806_v8 = vsel %vm875_vm13, %v1804_v7, %v1798_v24 }
 0xec9   :  { %2185 = vmatmul.msk.f32.gmra.mxu1 %vm127_vm2, %v1806_v8 }
 0xf3d   :  { %v1835_v9 = vpop.f32.mrf.mxu1 }
 0xf3e   :  { %v1841_v10 = vadd.f32 %v1835_v9, %v2954_v46 }
 0xf40   :  { %v3180_v25 = vadd.f32 %v2304_v6, %v1841_v10 }
 0xf42   :  { %v1854_v12 = vsel %vm127_vm2, %v3180_v25, 0.0 }
 0xf43   :  { %1855 = vadd.xlane.f32.xlu2 %v1854_v12 }
 0xf46   :  { %v1838_v13 = vpop.f32.mrf.mxu1 }
 0xf47   :  { %v1842_v16 = vadd.f32 %v1838_v13, %v2959_v48  ;;  %v2206_v13 = vld [vmem:[%s3339_s14 + $0xd0] sm:$0xff] }
 0xf49   :  { %v3185_v51 = vadd.f32 %v2304_v6, %v1842_v16  ;;  %v2205_v16 = vld [vmem:[%s3339_s14 + $0xc8] sm:$0xff] }
 0xf4b   :  { %v1857_v14 = vsel %vm127_vm2, %v3185_v51, 0.0 }
 0xf4c   :  { %1858 = vadd.xlane.f32.xlu0 %v1857_v14  ;;  %v2204_v14 = vld [vmem:[%s3339_s14 + $0xc0] sm:$0xff] }
 0xf60   :  { %2055 = vrot.lane.b32.xlu0 %v2685_v33, %s3373_s29 }
 0xf68   :  { %2063 = vrot.lane.b32.xlu0 %v3028_v3, %s2433_s25 }
 0xf70   :  { %2069 = vrot.lane.b32.xlu0 %v3012_v54, %s2433_s25 }
 0xfb6   :  { %v1856_v46 = vpop.xlane.xlu2 %1855 }
 0xfb7   :  { %v1860_v17 = vmul.f32 %v1856_v46, %v2612_v34  ;;  %v2203_v46 = vld [vmem:[%s3339_s14 + $0xb8] sm:$0xff] }
 0xfb9   :  { %v1862_v48 = vsub.f32 %v3180_v25, %v1860_v17  ;;  %v2202_v17 = vld [vmem:[%s3339_s14 + $0xb0] sm:$0xff] }
 0xfbb   :  { %v1864_v56 = vmul.f32 %v1862_v48, %v1862_v48 }
 0xfbd   :  { %v1866_v18 = vsel %vm127_vm2, %v1864_v56, 0.0  ;;  %v2200_v56 = vld [vmem:[%s3339_s14 + $0xa0] sm:$0xff] }
 0xfbe   :  { %1867 = vadd.xlane.f32.xlu1 %v1866_v18  ;;  %v2199_v18 = vld [vmem:[%s3339_s14 + $0x98] sm:$0xff] }
 0xfbf   :  { %v1859_v22 = vpop.xlane.xlu0 %1858 }
 0xfc0   :  { %v1861_v23 = vmul.f32 %v1859_v22, %v2612_v34  ;;  %v2198_v22 = vld [vmem:[%s3339_s14 + $0x90] sm:$0xff] }
 0xfc2   :  { %v3200_v33 = vsub.f32 %v3185_v51, %v1861_v23  ;;  %v2197_v23 = vld [vmem:[%s3339_s14 + $0x88] sm:$0xff] }
 0xfc4   :  { %v1865_v3 = vmul.f32 %v3200_v33, %v3200_v33 }
 0xfc6   :  { %v1869_v54 = vsel %vm127_vm2, %v1865_v3, 0.0  ;;  %v2307_v3 = vld [vmem:[%s3371_s20 + $0x1] ss:$0 sm:$0xff] }
 0xfc7   :  { %1870 = vadd.xlane.f32.xlu2 %v1869_v54 }
 0xfd2   :  { %v2056_v19 = vpop.permute.xlu0 %2055 }
 0xfd7   :  { %2057 = vrot.lane.b32.xlu1 %v2682_v27, %s3373_s29  ;;  %v2190_v27 = vld [vmem:[%s3337_s12 + $0x28] sm:$0xff] }
 0xfd8   :  { %1938 = vmatpush.msrb.mxu2 %v2190_v27 }
 0xfda   :  { %v2064_v11 = vpop.permute.xlu0 %2063 }
 0xfdf   :  { %2067 = vrot.lane.b32.xlu1 %v3021_v60, %s2433_s25  ;;  %2061 = vrot.lane.b32.xlu2 %v3036_v5, %s2433_s25  ;;  %v2189_v60 = vld [vmem:[%s3337_s12 + $0x20] sm:$0xff]  ;;  %s2089_s12 = sshll.u32 %s3343_s18, 4  ;;  %s2090_s12 = int_to_ptr.hbm [resolvable:$true] %s2089_s12 }
 0xfe0   :  { %1939 = vmatpush.msrb.mxu2 %v2189_v60 }
 0xfe2   :  { %v2070_v2 = vpop.permute.xlu0 %2069 }
0x1031   :  { %v1868_v5 = vpop.xlane.xlu1 %1867 }
0x1032   :  { %v1872_v21 = vmul.f32 %v1868_v5, %v2612_v34 }
0x1034   :  { %v1874_v28 = vadd.f32 1e-05, %v1872_v21 }
0x1036   :  { %2392 = vrsqrt.f32 %v1874_v28  ;;  %vm1882_vm12 = vweird.f32 %v1874_v28 }
0x103a   :  { %v1871_v31 = vpop.xlane.xlu2 %1870 }
0x103b   :  { %v1873_v36 = vmul.f32 %v1871_v31, %v2612_v34  ;;  %v2305_v34 = vld [vmem:[%s3335_s10 + $0x1] ss:$0 sm:$0xff] }
0x103c   :  { %v2393_v37 = vpop.eup %2392 }
0x103d   :  { %v1877_v38 = vmul.f32 %v2393_v37, %v1874_v28  ;;  %v1875_v40 = vadd.f32 1e-05, %v1873_v36  ;;  %vm1883_vm10 = vweird.f32 %v2393_v37 }
0x103e   :  { %vm1884_vm13 = vmor %vm1882_vm12, %vm1883_vm10 }
0x103f   :  { %v1878_v44 = vmul.f32 %v2393_v37, %v1877_v38  ;;  %2394 = vrsqrt.f32 %v1875_v40  ;;  %vm1892_vm1 = vweird.f32 %v1875_v40 }
0x1041   :  { %v1879_v39 = vmul.f32 0.5, %v1878_v44 }
0x1042   :  { %v2062_v42 = vpop.permute.xlu2 %2061 }
0x1043   :  { %v1880_v45 = vsub.f32 1.5, %v1879_v39 }
0x1045   :  { %v2395_v47 = vpop.eup %2394  ;;  %v1881_v50 = vmul.f32 %v2393_v37, %v1880_v45 }
0x1046   :  { %v1887_v62 = vmul.f32 %v2395_v47, %v1875_v40  ;;  %vm1893_vm0 = vweird.f32 %v2395_v47 }
0x1047   :  { %v1885_v53 = vsel %vm1884_vm13, %v2393_v37, %v1881_v50  ;;  %vm1894_vm3 = vmor %vm1892_vm1, %vm1893_vm0  ;;  %v2016_v50 = vld [vmem:[%s3341_s16 + $0x10] sm:$0xff] }
0x1048   :  { %v1896_v52 = vmul.f32 %v1885_v53, %v1862_v48  ;;  %v1888_v55 = vmul.f32 %v2395_v47, %v1887_v62  ;;  %v2201_v48 = vld [vmem:[%s3339_s14 + $0xa8] sm:$0xff]  ;;  %2041 = vmatpush.msra.mxu0 %v2016_v50  ;;  %v2014_v62 = vld [vmem:[%s3341_s16] sm:$0xff] }
0x1049   :  { %v2058_v4 = vpop.permute.xlu1 %2057  ;;  %v2308_v53 = vld [vmem:[%s3340_s15 + $0x1] ss:$0 sm:$0xff]  ;;  %s2443_s15 = smov [#allocation2]  }
0x104a   :  { %v1901_v59 = vmul.f32 %v2305_v34, %v1896_v52  ;;  %v1889_v61 = vmul.f32 0.5, %v1888_v55  ;;  %v2074_v63 = vsel %vm127_vm2, %v2736_v1, %v2058_v4  ;;  %v2073_v1 = vsel %vm127_vm2, %v2734_v0, %v2056_v19  ;;  %v2207_v0 = vld [vmem:[%s3339_s14 + $0xd8] sm:$0xff] }
0x104b   :  { %v2077_v49 = vsel %vm2075_vm15, %v2074_v63, %v2064_v11  ;;  %v2076_v7 = vsel %vm2075_vm15, %v2073_v1, %v2062_v42  ;;  %1986 = vmatpush.msra.mxu3 %v2207_v0  ;;  %v2309_v63 = vld [vmem:[%s3342_s17] ss:$0 sm:$0xff] }
0x104c   :  { %v1890_v58 = vsub.f32 1.5, %v1889_v61  ;;  %v1906_v35 = vadd.f32 %v2306_v57, %v1901_v59  ;;  %v2080_v41 = vsel %vm2078_vm14, %v2077_v49, %v2070_v2 }
0x104d   :  { %2082 = vst [vmem:[%s3344_s19 + $0x8] sm:$0xff] %v2080_v41  ;;  %1987 = vmatpush.msra.mxu3 %v2206_v13 }
0x104e   :  { %v1891_v43 = vmul.f32 %v2395_v47, %v1890_v58  ;;  %2194 = vmatmul.msk.f32.vlgmr.msrb.gmra.mxu2 %vm127_vm2, %v1906_v35 }
0x104f   :  { %1988 = vmatpush.msra.mxu3 %v2205_v16 }
0x1050   :  { %v1895_v24 = vsel %vm1894_vm3, %v2395_v47, %v1891_v43 }
0x1051   :  { %v2068_v8 = vpop.permute.xlu1 %2067  ;;  %v1897_v6 = vmul.f32 %v1895_v24, %v3200_v33  ;;  %1989 = vmatpush.msra.mxu3 %v2204_v14  ;;  %v2196_v33 = vld [vmem:[%s3339_s14 + $0x80] sm:$0xff] }
0x1052   :  { %v2079_v9 = vsel %vm2078_vm14, %v2076_v7, %v2068_v8 }
0x1053   :  { %2081 = vst [vmem:[%s3344_s19] sm:$0xff] %v2079_v9  ;;  %v1902_v10 = vmul.f32 %v2305_v34, %v1897_v6  ;;  %1990 = vmatpush.msra.mxu3 %v2203_v46  ;;  %v2015_v34 = vld [vmem:[%s3341_s16 + $0x8] sm:$0xff]  ;;  %s2087_s16 = sshll.u32 %s2443_s15, 4  ;;  %s2088_s16 = int_to_ptr.vmem [resolvable:$true] %s2087_s16 }
0x1054   :  { %2042 = vmatpush.msra.mxu0 %v2015_v34 }
0x1055   :  { %v1907_v12 = vadd.f32 %v2306_v57, %v1902_v10  ;;  %1991 = vmatpush.msra.mxu3 %v2202_v17 }
0x1056   :  { %2043 = vmatpush.msra.mxu0 %v2014_v62 }
0x1057   :  { %2195 = vmatmul.msk.f32.gmra.mxu2 %vm127_vm2, %v1907_v12  ;;  %1992 = vmatpush.msra.mxu3 %v2201_v48 }
0x1059   :  { %1993 = vmatpush.msra.mxu3 %v2200_v56 }
0x105b   :  { %1994 = vmatpush.msra.mxu3 %v2199_v18 }
0x105d   :  { %1995 = vmatpush.msra.mxu3 %v2198_v22 }
0x105f   :  { %1996 = vmatpush.msra.mxu3 %v2197_v23 }
0x1061   :  { %1997 = vmatpush.msra.mxu3 %v2196_v33 }
0x10d1   :  { %v1941_v54 = vpop.f32.mrf.mxu2 }
0x10d2   :  { %v1942_v15 = vadd.f32 %v2307_v3, %v1941_v54 }
0x10d4   :  { %v1949_v27 = vmul.f32 0.044715, %v1942_v15  ;;  %v1947_v37 = vmul.f32 0.5, %v1942_v15 }
0x10d6   :  { %v1951_v60 = vmul.f32 %v1949_v27, %v1942_v15 }
0x10d8   :  { %v1953_v5 = vmul.f32 %v1951_v60, %v1942_v15 }
0x10da   :  { %v1944_v21 = vpop.f32.mrf.mxu2  ;;  %v1955_v28 = vadd.f32 %v1953_v5, %v1942_v15 }
0x10db   :  { %v1945_v19 = vadd.f32 %v2307_v3, %v1944_v21 }
0x10dc   :  { %v1957_v20 = vmul.f32 0.7978846, %v1955_v28 }
0x10dd   :  { %v1950_v29 = vmul.f32 0.044715, %v1945_v19  ;;  %v1948_v39 = vmul.f32 0.5, %v1945_v19 }
0x10de   :  { %2396 = vtanh.f32 %v1957_v20 }
0x10df   :  { %v1952_v30 = vmul.f32 %v1950_v29, %v1945_v19 }
0x10e1   :  { %v1954_v31 = vmul.f32 %v1952_v30, %v1945_v19 }
0x10e3   :  { %v1956_v36 = vadd.f32 %v1954_v31, %v1945_v19 }
0x10e4   :  { %v2397_v32 = vpop.eup %2396 }
0x10e5   :  { %v1961_v38 = vadd.f32 1.0, %v2397_v32  ;;  %v1958_v40 = vmul.f32 0.7978846, %v1956_v36 }
0x10e7   :  { %v1963_v44 = vmul.f32 %v1961_v38, %v1947_v37  ;;  %2398 = vtanh.f32 %v1958_v40 }
0x10e9   :  { %1998 = vmatmul.f32.vlgmr.msra.gmra.mxu3 %v1963_v44 }
0x10ed   :  { %v2399_v11 = vpop.eup %2398 }
0x10ee   :  { %v1962_v45 = vadd.f32 1.0, %v2399_v11 }
0x10f0   :  { %v1964_v47 = vmul.f32 %v1962_v45, %v1948_v39 }
0x10f2   :  { %2001 = vmatmul.f32.gmra.mxu3 %v1964_v47 }
0x116c   :  { %v1999_v52 = vpop.f32.mrf.mxu3 }
0x116d   :  { %v2005_v55 = vadd.f32 %v1999_v52, %v3180_v25 }
0x116f   :  { %v2012_v57 = vadd.f32 %v2308_v53, %v2005_v55 }
0x1171   :  { %2213 = vmatmul.msk.f32.vlgmr.msra.gmra.mxu0 %vm127_vm2, %v2012_v57 }
0x1175   :  { %v2002_v4 = vpop.f32.mrf.mxu3 }
0x1176   :  { %v2006_v59 = vadd.f32 %v2002_v4, %v3185_v51 }
0x1178   :  { %v2013_v61 = vadd.f32 %v2308_v53, %v2006_v59 }
0x117a   :  { %2214 = vmatmul.msk.f32.gmra.mxu0 %vm127_vm2, %v2013_v61 }
0x11ee   :  { %v2045_v2 = vpop.f32.mrf.mxu0 }
0x11ef   :  { %v2046_v49 = vadd.f32 %v2309_v63, %v2045_v2 }
0x11f1   :  { %2051 = vst [vmem:[#allocation2] sm:$0xff] %v2046_v49 }
0x11f7   :  { %v2048_v25 = vpop.f32.mrf.mxu0 }
0x11f8   :  { %v2049_v58 = vadd.f32 %v2309_v63, %v2048_v25 }
0x11fa   :  { %2052 = vst [vmem:[#allocation2 + $0x8] sm:$0xff] %v2049_v58 }
0x11fb   :  { %2095 = dma.vmem_to_hbm [thread:$0]  %s2088_s16, 256, %s2090_s12, [#allocation3], %s2444_s0, %s2444_s0, %s3375_s3  }
0x11fc   :  { %2428 = dma.done.wait [#allocation3], 256  }
0x11fd   :  { %2429 = vsyncadd [#allocation3], 4294967040 }
0x11fe   :  { %2104 = vsyncpa [#allocation3], 1 }

</bundles_post_ra>
